<compile_context>
chip_gen: v6e
topology: v6e:2x2x1
jax: 0.10.0
libtpu: 0.0.40
codegen_flags: <defaults>
</compile_context>

<pallas_src>
import jax
import jax.numpy as jnp
from jax.experimental import pallas as pl
from jax.experimental.pallas import tpu as pltpu


LANE = 128                      # lane-dense padding target for GEMM N dims
_ICP1 = 8                       # conv1 input channels padded 3 -> 8
_VMEM_LIMIT = 32 * 1024 * 1024  # explicit scoped-VMEM budget (safe on v5e/v6e/v7x)


def _round_up(v, m):
    return ((v + m - 1) // m) * m


def _choose_tm(m, cap=1024):
    """Row tile: multiple of 8, >=2 grid steps when m >= 32 (v7x), capped."""
    m8 = _round_up(max(m, 1), 8)
    if m8 < 32:
        return m8
    return min(cap, _round_up((m + 1) // 2, 8))


# ---------------------------------------------------------------------------
# Pallas kernels
# ---------------------------------------------------------------------------
def _conv_relu_pool_kernel(x_ref, w_ref, b_ref, o_ref):
    """One M-tile of relu(cols @ w + b), max-accumulated over the 4 pool
    positions (grid axis 1).  Pool max runs in bf16 (exact)."""
    g = pl.program_id(1)
    acc = jnp.dot(x_ref[0], w_ref[...], preferred_element_type=jnp.float32)
    t = jnp.maximum(acc + b_ref[...], 0.0).astype(o_ref.dtype)

    @pl.when(g == 0)
    def _():
        o_ref[...] = t

    @pl.when(g > 0)
    def _():
        o_ref[...] = jnp.maximum(o_ref[...], t)


def _mlp_kernel(x_ref, w1_ref, b1_ref, w2_ref, b2_ref, w3_ref, b3_ref, o_ref):
    """Fused fc1(ReLU) -> fc2(ReLU) -> fc3, all weights resident in VMEM."""
    h = jnp.dot(x_ref[...], w1_ref[...], preferred_element_type=jnp.float32)
    h = jnp.maximum(h + b1_ref[...], 0.0).astype(jnp.bfloat16)
    h = jnp.dot(h, w2_ref[...], preferred_element_type=jnp.float32)
    h = jnp.maximum(h + b2_ref[...], 0.0).astype(jnp.bfloat16)
    h = jnp.dot(h, w3_ref[...], preferred_element_type=jnp.float32)
    o_ref[...] = (h + b3_ref[...]).astype(o_ref.dtype)


# ---------------------------------------------------------------------------
# XLA glue: strided im2col, one group per 2x2 pool position
# ---------------------------------------------------------------------------
def _im2col_pooled(x, kh, kw):
    """(B,H,W,C) -> (4, B*Po*Qo, kh*kw*C).  Group g=(hr,wc) holds the im2col
    patches of the conv-output pixels (2*po+hr, 2*qo+wc); K order is (i,j,c)."""
    B, H, W, C = x.shape
    Po, Qo = (H - kh + 1) // 2, (W - kw + 1) // 2
    groups = []
    for hr in range(2):
        for wc in range(2):
            patches = []
            for di in range(kh):
                for dj in range(kw):
                    patches.append(
                        x[:, hr + di: hr + di + 2 * Po: 2,
                             wc + dj: wc + dj + 2 * Qo: 2, :])   # (B,Po,Qo,C)
            cols = jnp.stack(patches, axis=3)                     # (B,Po,Qo,kh*kw,C)
            groups.append(cols.reshape(B * Po * Qo, kh * kw * C))
    return jnp.stack(groups, axis=0), (B, Po, Qo)


# ---------------------------------------------------------------------------
# Wrappers around pallas_call
# ---------------------------------------------------------------------------
def conv_relu_pool(x, w2, b2, *, kh, kw):
    """Valid conv (stride 1) + ReLU + 2x2/2 max-pool, fused in one kernel.
    x: (B,H,W,C) bf16 -> (B, Po, Qo, 128) bf16 (out-channels lane-padded)."""
    cols4, (B, Po, Qo) = _im2col_pooled(x, kh, kw)
    Mg, K = cols4.shape[1], cols4.shape[2]
    N = w2.shape[1]
    TM = _choose_tm(Mg)
    out = pl.pallas_call(
        _conv_relu_pool_kernel,
        out_shape=jax.ShapeDtypeStruct((Mg, N), jnp.bfloat16),
        grid=(pl.cdiv(Mg, TM), 4),                 # pool-position axis last
        in_specs=[
            pl.BlockSpec((1, TM, K), lambda m, g: (g, m, 0)),
            pl.BlockSpec((K, N), lambda m, g: (0, 0)),
            pl.BlockSpec((1, N), lambda m, g: (0, 0)),
        ],
        out_specs=pl.BlockSpec((TM, N), lambda m, g: (m, 0)),
        compiler_params=pltpu.CompilerParams(
            dimension_semantics=("parallel", "arbitrary"),
            vmem_limit_bytes=_VMEM_LIMIT,
        ),
    )(cols4, w2, b2)
    return out.reshape(B, Po, Qo, N)


def mlp_fused(x, w1, b1, w2, b2, w3, b3):
    """Fused fc1->fc2->fc3 in one pallas_call.  x: (M, K) bf16 -> (M, 128) f32."""
    M, K = x.shape
    Mp = _round_up(M, 8)
    if Mp != M:
        x = jnp.pad(x, ((0, Mp - M), (0, 0)))
    TM = _choose_tm(Mp)
    out = pl.pallas_call(
        _mlp_kernel,
        out_shape=jax.ShapeDtypeStruct((Mp, w3.shape[1]), jnp.float32),
        grid=(pl.cdiv(Mp, TM),),
        in_specs=[
            pl.BlockSpec((TM, K), lambda i: (i, 0)),
            pl.BlockSpec(w1.shape, lambda i: (0, 0)),
            pl.BlockSpec(b1.shape, lambda i: (0, 0)),
            pl.BlockSpec(w2.shape, lambda i: (0, 0)),
            pl.BlockSpec(b2.shape, lambda i: (0, 0)),
            pl.BlockSpec(w3.shape, lambda i: (0, 0)),
            pl.BlockSpec(b3.shape, lambda i: (0, 0)),
        ],
        out_specs=pl.BlockSpec((TM, w3.shape[1]), lambda i: (i, 0)),
        compiler_params=pltpu.CompilerParams(
            dimension_semantics=("parallel",),
            vmem_limit_bytes=_VMEM_LIMIT,
        ),
    )(x, w1, b1, w2, b2, w3, b3)
    return out[:M]


# ---------------------------------------------------------------------------
# Parameters (PyTorch conventions) + one-time conversion to kernel layouts
# ---------------------------------------------------------------------------
def init_params(key):
    ks = jax.random.split(key, 10)
    scale = 0.05
    return {
        "conv1_w": jax.random.normal(ks[0], (16, 3, 5, 5), jnp.float32) * scale,
        "conv1_b": jax.random.normal(ks[1], (16,), jnp.float32) * scale,
        "conv2_w": jax.random.normal(ks[2], (32, 16, 5, 5), jnp.float32) * scale,
        "conv2_b": jax.random.normal(ks[3], (32,), jnp.float32) * scale,
        # fc1 acts on torch's .view(-1, 32*5*5) flatten order, i.e. (c, h, w).
        "fc1_w": jax.random.normal(ks[4], (32 * 5 * 5, 120), jnp.float32) * scale,
        "fc1_b": jax.random.normal(ks[5], (120,), jnp.float32) * scale,
        "fc2_w": jax.random.normal(ks[6], (120, 84), jnp.float32) * scale,
        "fc2_b": jax.random.normal(ks[7], (84,), jnp.float32) * scale,
        "fc3_w": jax.random.normal(ks[8], (84, 10), jnp.float32) * scale,
        "fc3_b": jax.random.normal(ks[9], (10,), jnp.float32) * scale,
    }


def _pad_to(x, shape):
    return jnp.pad(x, [(0, t - s) for s, t in zip(x.shape, shape)])


def prepare_params(p):
    """Lane-dense (128) padding on N only; true channel counts on K; bf16 weights."""
    # conv1: (OC, IC, KH, KW) -> (KH, KW, ICp=8, OCp=128) -> (200, 128)
    w = p["conv1_w"].transpose(2, 3, 1, 0)                          # (5,5,3,16)
    conv1_w = _pad_to(w, (5, 5, _ICP1, LANE)).reshape(5 * 5 * _ICP1, LANE).astype(jnp.bfloat16)
    conv1_b = _pad_to(p["conv1_b"], (LANE,)).reshape(1, LANE)

    # conv2: K keeps the TRUE 16 input channels -> (400, 128)
    w = p["conv2_w"].transpose(2, 3, 1, 0)                          # (5,5,16,32)
    conv2_w = _pad_to(w, (5, 5, 16, LANE)).reshape(5 * 5 * 16, LANE).astype(jnp.bfloat16)
    conv2_b = _pad_to(p["conv2_b"], (LANE,)).reshape(1, LANE)

    # fc1: rows permuted from torch's (c,h,w) order to channels-last (h,w,c) -> (800, 128)
    w = p["fc1_w"].reshape(32, 5, 5, 120).transpose(1, 2, 0, 3)     # (5,5,32,120)
    fc1_w = _pad_to(w, (5, 5, 32, LANE)).reshape(5 * 5 * 32, LANE).astype(jnp.bfloat16)
    fc1_b = _pad_to(p["fc1_b"], (LANE,)).reshape(1, LANE)

    fc2_w = _pad_to(p["fc2_w"], (LANE, LANE)).astype(jnp.bfloat16)
    fc2_b = _pad_to(p["fc2_b"], (LANE,)).reshape(1, LANE)
    fc3_w = _pad_to(p["fc3_w"], (LANE, LANE)).astype(jnp.bfloat16)
    fc3_b = _pad_to(p["fc3_b"], (LANE,)).reshape(1, LANE)

    return dict(conv1_w=conv1_w, conv1_b=conv1_b,
                conv2_w=conv2_w, conv2_b=conv2_b,
                fc1_w=fc1_w, fc1_b=fc1_b,
                fc2_w=fc2_w, fc2_b=fc2_b,
                fc3_w=fc3_w, fc3_b=fc3_b)


# ---------------------------------------------------------------------------
# LeNet forward (Pallas path)
# ---------------------------------------------------------------------------
@jax.jit
def lenet_forward(kp, x):
    # x: (B, 3, 32, 32) NCHW float32 (PyTorch convention)
    B = x.shape[0]
    x = jnp.transpose(x, (0, 2, 3, 1))                               # NHWC
    x = jnp.pad(x, ((0, 0), (0, 0), (0, 0), (0, _ICP1 - 3)))         # C: 3 -> 8
    x = x.astype(jnp.bfloat16)

    x = conv_relu_pool(x, kp["conv1_w"], kp["conv1_b"], kh=5, kw=5)  # (B,14,14,128)
    x = x[..., :16]                                                  # true channels
    x = conv_relu_pool(x, kp["conv2_w"], kp["conv2_b"], kh=5, kw=5)  # (B, 5, 5,128)
    x = x[..., :32]                                                  # true channels
    x = x.reshape(B, 5 * 5 * 32)                                     # (B,800), (h,w,c)
    logits = mlp_fused(x, kp["fc1_w"], kp["fc1_b"],
                       kp["fc2_w"], kp["fc2_b"],
                       kp["fc3_w"], kp["fc3_b"])                     # (B,128) f32
    return logits[:, :10]


# ---------------------------------------------------------------------------
# Pure-JAX f32 reference (PyTorch semantics) for a correctness check
# ---------------------------------------------------------------------------
def lenet_reference(p, x):
    dn = ("NCHW", "OIHW", "NCHW")
    y = jax.lax.conv_general_dilated(x, p["conv1_w"], (1, 1), "VALID",
                                     dimension_numbers=dn)
    y = jax.nn.relu(y + p["conv1_b"][None, :, None, None])
    y = jax.lax.reduce_window(y, -jnp.inf, jax.lax.max,
                              (1, 1, 2, 2), (1, 1, 2, 2), "VALID")
    y = jax.lax.conv_general_dilated(y, p["conv2_w"], (1, 1), "VALID",
                                     dimension_numbers=dn)
    y = jax.nn.relu(y + p["conv2_b"][None, :, None, None])
    y = jax.lax.reduce_window(y, -jnp.inf, jax.lax.max,
                              (1, 1, 2, 2), (1, 1, 2, 2), "VALID")
    y = y.reshape(x.shape[0], -1)                                    # (c,h,w) order
    y = jax.nn.relu(y @ p["fc1_w"] + p["fc1_b"])
    y = jax.nn.relu(y @ p["fc2_w"] + p["fc2_b"])
    return y @ p["fc3_w"] + p["fc3_b"]


if __name__ == "__main__":
    key = jax.random.PRNGKey(0)
    pkey, xkey = jax.random.split(key)
    params = init_params(pkey)
    kparams = prepare_params(params)
    # LeNet's fc1 (32*5*5) implies 32x32 spatial input; keep batch small.
    x = jax.random.normal(xkey, (2, 3, 32, 32), jnp.float32)

    out = jax.block_until_ready(lenet_forward(kparams, x))
    assert out.shape == (2, 10), out.shape

    # bf16 GEMMs vs f32 reference -> allow ~1e-2-level relative drift.
    ref = lenet_reference(params, x)
    err = float(jnp.max(jnp.abs(out.astype(jnp.float32) - ref)))
    tol = 2e-2 + 5e-2 * float(jnp.max(jnp.abs(ref)))
    assert err <= tol, f"mismatch vs reference: max|diff|={err:.4e} tol={tol:.4e}"

    print("KERNEL_OK")
</pallas_src>

<mosaic_0001>
module attributes {stable_mosaic.version = 11 : i64} {
  func.func @_conv_relu_pool_kernel(%arg0: i32, %arg1: i32, %arg2: memref<1x200x200xbf16, #tpu.memory_space<vmem>>, %arg3: memref<200x128xbf16, #tpu.memory_space<vmem>>, %arg4: memref<1x128xf32, #tpu.memory_space<vmem>>, %arg5: memref<200x128xbf16, #tpu.memory_space<vmem>>) attributes {dimension_semantics = [#tpu.dimension_semantics<parallel>, #tpu.dimension_semantics<arbitrary>], iteration_bounds = array<i64: 2, 4>, scalar_prefetch = 0 : i64, scratch_operands = 0 : i64, tpu.core_type = #tpu.core_type<tc>, window_params = [{transform_indices = @transform_0, window_bounds = array<i64: 1, 200, 200>}, {pipeline_mode = #tpu.pipeline_mode<synchronous>, transform_indices = @transform_1, window_bounds = array<i64: 200, 128>}, {pipeline_mode = #tpu.pipeline_mode<synchronous>, transform_indices = @transform_2, window_bounds = array<i64: 1, 128>}, {transform_indices = @transform_3, window_bounds = array<i64: 200, 128>}]} {
    %c0 = arith.constant 0 : index
    %c0_0 = arith.constant 0 : index
    %c0_1 = arith.constant 0 : index
    %0 = vector.load %arg2[%c0, %c0_0, %c0_1] : memref<1x200x200xbf16, #tpu.memory_space<vmem>>, vector<1x200x200xbf16>
    %1 = vector.shape_cast %0 : vector<1x200x200xbf16> to vector<200x200xbf16>
    %c0_2 = arith.constant 0 : index
    %c0_3 = arith.constant 0 : index
    %2 = vector.load %arg3[%c0_2, %c0_3] : memref<200x128xbf16, #tpu.memory_space<vmem>>, vector<200x128xbf16>
    %cst = arith.constant dense<0.000000e+00> : vector<200x128xf32>
    %3 = tpu.matmul %1, %2, %cst {dimension_numbers = #tpu.dot_dimension_numbers<[1], [0], [0], [1], [0, 0, 1, 1], [], []>} : vector<200x200xbf16>, vector<200x128xbf16>, vector<200x128xf32> -> vector<200x128xf32>
    %c0_4 = arith.constant 0 : index
    %c0_5 = arith.constant 0 : index
    %4 = vector.load %arg4[%c0_4, %c0_5] : memref<1x128xf32, #tpu.memory_space<vmem>>, vector<1x128xf32>
    %5 = vector.broadcast %4 : vector<1x128xf32> to vector<200x128xf32>
    %6 = arith.addf %3, %5 : vector<200x128xf32>
    %cst_6 = arith.constant 0.000000e+00 : f32
    %7 = vector.broadcast %cst_6 : f32 to vector<200x128xf32>
    %8 = arith.maximumf %6, %7 : vector<200x128xf32>
    %9 = arith.truncf %8 : vector<200x128xf32> to vector<200x128xbf16>
    %c0_i32 = arith.constant 0 : i32
    %10 = arith.cmpi eq, %arg1, %c0_i32 : i32
    %11 = arith.extui %10 : i1 to i32
    %c0_i32_7 = arith.constant 0 : i32
    %12 = arith.cmpi ne, %11, %c0_i32_7 : i32
    scf.if %12 {
      %c0_10 = arith.constant 0 : index
      %c0_11 = arith.constant 0 : index
      %16 = vector.load %arg5[%c0_10, %c0_11] : memref<200x128xbf16, #tpu.memory_space<vmem>>, vector<200x128xbf16>
      tpu.vector_store %arg5[%c0_10, %c0_11], %9 {strides = array<i32>} : memref<200x128xbf16, #tpu.memory_space<vmem>>, vector<200x128xbf16>,
    } else {
    }
    %c0_i32_8 = arith.constant 0 : i32
    %13 = arith.cmpi sgt, %arg1, %c0_i32_8 : i32
    %14 = arith.extui %13 : i1 to i32
    %c0_i32_9 = arith.constant 0 : i32
    %15 = arith.cmpi ne, %14, %c0_i32_9 : i32
    scf.if %15 {
      %c0_10 = arith.constant 0 : index
      %c0_11 = arith.constant 0 : index
      %16 = vector.load %arg5[%c0_10, %c0_11] : memref<200x128xbf16, #tpu.memory_space<vmem>>, vector<200x128xbf16>
      %17 = arith.maximumf %16, %9 : vector<200x128xbf16>
      %c0_12 = arith.constant 0 : index
      %c0_13 = arith.constant 0 : index
      %18 = vector.load %arg5[%c0_12, %c0_13] : memref<200x128xbf16, #tpu.memory_space<vmem>>, vector<200x128xbf16>
      tpu.vector_store %arg5[%c0_12, %c0_13], %17 {strides = array<i32>} : memref<200x128xbf16, #tpu.memory_space<vmem>>, vector<200x128xbf16>,
    } else {
    }
    return
  }
  func.func @transform_0(%arg0: i32, %arg1: i32) -> (i32, i32, i32) {
    %c0_i32 = arith.constant 0 : i32
    %c0_i32_0 = arith.constant 0 : i32
    return %arg1, %arg0, %c0_i32 : i32, i32, i32
  }
  func.func @transform_1(%arg0: i32, %arg1: i32) -> (i32, i32) {
    %c0_i32 = arith.constant 0 : i32
    %c0_i32_0 = arith.constant 0 : i32
    %c0_i32_1 = arith.constant 0 : i32
    return %c0_i32, %c0_i32_0 : i32, i32
  }
  func.func @transform_2(%arg0: i32, %arg1: i32) -> (i32, i32) {
    %c0_i32 = arith.constant 0 : i32
    %c0_i32_0 = arith.constant 0 : i32
    %c0_i32_1 = arith.constant 0 : i32
    return %c0_i32, %c0_i32_0 : i32, i32
  }
  func.func @transform_3(%arg0: i32, %arg1: i32) -> (i32, i32) {
    %c0_i32 = arith.constant 0 : i32
    %c0_i32_0 = arith.constant 0 : i32
    return %arg0, %c0_i32 : i32, i32
  }
}

module attributes {stable_mosaic.version = 11 : i64} {
  func.func @_conv_relu_pool_kernel(%arg0: i32, %arg1: i32, %arg2: memref<1x32x400xbf16, #tpu.memory_space<vmem>>, %arg3: memref<400x128xbf16, #tpu.memory_space<vmem>>, %arg4: memref<1x128xf32, #tpu.memory_space<vmem>>, %arg5: memref<32x128xbf16, #tpu.memory_space<vmem>>) attributes {dimension_semantics = [#tpu.dimension_semantics<parallel>, #tpu.dimension_semantics<arbitrary>], iteration_bounds = array<i64: 2, 4>, scalar_prefetch = 0 : i64, scratch_operands = 0 : i64, tpu.core_type = #tpu.core_type<tc>, window_params = [{transform_indices = @transform_0, window_bounds = array<i64: 1, 32, 400>}, {pipeline_mode = #tpu.pipeline_mode<synchronous>, transform_indices = @transform_1, window_bounds = array<i64: 400, 128>}, {pipeline_mode = #tpu.pipeline_mode<synchronous>, transform_indices = @transform_2, window_bounds = array<i64: 1, 128>}, {transform_indices = @transform_3, window_bounds = array<i64: 32, 128>}]} {
    %c0 = arith.constant 0 : index
    %c0_0 = arith.constant 0 : index
    %c0_1 = arith.constant 0 : index
    %0 = vector.load %arg2[%c0, %c0_0, %c0_1] : memref<1x32x400xbf16, #tpu.memory_space<vmem>>, vector<1x32x400xbf16>
    %1 = vector.shape_cast %0 : vector<1x32x400xbf16> to vector<32x400xbf16>
    %c0_2 = arith.constant 0 : index
    %c0_3 = arith.constant 0 : index
    %2 = vector.load %arg3[%c0_2, %c0_3] : memref<400x128xbf16, #tpu.memory_space<vmem>>, vector<400x128xbf16>
    %cst = arith.constant dense<0.000000e+00> : vector<32x128xf32>
    %3 = tpu.matmul %1, %2, %cst {dimension_numbers = #tpu.dot_dimension_numbers<[1], [0], [0], [1], [0, 0, 1, 1], [], []>} : vector<32x400xbf16>, vector<400x128xbf16>, vector<32x128xf32> -> vector<32x128xf32>
    %c0_4 = arith.constant 0 : index
    %c0_5 = arith.constant 0 : index
    %4 = vector.load %arg4[%c0_4, %c0_5] : memref<1x128xf32, #tpu.memory_space<vmem>>, vector<1x128xf32>
    %5 = vector.broadcast %4 : vector<1x128xf32> to vector<32x128xf32>
    %6 = arith.addf %3, %5 : vector<32x128xf32>
    %cst_6 = arith.constant 0.000000e+00 : f32
    %7 = vector.broadcast %cst_6 : f32 to vector<32x128xf32>
    %8 = arith.maximumf %6, %7 : vector<32x128xf32>
    %9 = arith.truncf %8 : vector<32x128xf32> to vector<32x128xbf16>
    %c0_i32 = arith.constant 0 : i32
    %10 = arith.cmpi eq, %arg1, %c0_i32 : i32
    %11 = arith.extui %10 : i1 to i32
    %c0_i32_7 = arith.constant 0 : i32
    %12 = arith.cmpi ne, %11, %c0_i32_7 : i32
    scf.if %12 {
      %c0_10 = arith.constant 0 : index
      %c0_11 = arith.constant 0 : index
      %16 = vector.load %arg5[%c0_10, %c0_11] : memref<32x128xbf16, #tpu.memory_space<vmem>>, vector<32x128xbf16>
      tpu.vector_store %arg5[%c0_10, %c0_11], %9 {strides = array<i32>} : memref<32x128xbf16, #tpu.memory_space<vmem>>, vector<32x128xbf16>,
    } else {
    }
    %c0_i32_8 = arith.constant 0 : i32
    %13 = arith.cmpi sgt, %arg1, %c0_i32_8 : i32
    %14 = arith.extui %13 : i1 to i32
    %c0_i32_9 = arith.constant 0 : i32
    %15 = arith.cmpi ne, %14, %c0_i32_9 : i32
    scf.if %15 {
      %c0_10 = arith.constant 0 : index
      %c0_11 = arith.constant 0 : index
      %16 = vector.load %arg5[%c0_10, %c0_11] : memref<32x128xbf16, #tpu.memory_space<vmem>>, vector<32x128xbf16>
      %17 = arith.maximumf %16, %9 : vector<32x128xbf16>
      %c0_12 = arith.constant 0 : index
      %c0_13 = arith.constant 0 : index
      %18 = vector.load %arg5[%c0_12, %c0_13] : memref<32x128xbf16, #tpu.memory_space<vmem>>, vector<32x128xbf16>
      tpu.vector_store %arg5[%c0_12, %c0_13], %17 {strides = array<i32>} : memref<32x128xbf16, #tpu.memory_space<vmem>>, vector<32x128xbf16>,
    } else {
    }
    return
  }
  func.func @transform_0(%arg0: i32, %arg1: i32) -> (i32, i32, i32) {
    %c0_i32 = arith.constant 0 : i32
    %c0_i32_0 = arith.constant 0 : i32
    return %arg1, %arg0, %c0_i32 : i32, i32, i32
  }
  func.func @transform_1(%arg0: i32, %arg1: i32) -> (i32, i32) {
    %c0_i32 = arith.constant 0 : i32
    %c0_i32_0 = arith.constant 0 : i32
    %c0_i32_1 = arith.constant 0 : i32
    return %c0_i32, %c0_i32_0 : i32, i32
  }
  func.func @transform_2(%arg0: i32, %arg1: i32) -> (i32, i32) {
    %c0_i32 = arith.constant 0 : i32
    %c0_i32_0 = arith.constant 0 : i32
    %c0_i32_1 = arith.constant 0 : i32
    return %c0_i32, %c0_i32_0 : i32, i32
  }
  func.func @transform_3(%arg0: i32, %arg1: i32) -> (i32, i32) {
    %c0_i32 = arith.constant 0 : i32
    %c0_i32_0 = arith.constant 0 : i32
    return %arg0, %c0_i32 : i32, i32
  }
}

module attributes {stable_mosaic.version = 11 : i64} {
  func.func @_mlp_kernel(%arg0: i32, %arg1: memref<8x800xbf16, #tpu.memory_space<vmem>>, %arg2: memref<800x128xbf16, #tpu.memory_space<vmem>>, %arg3: memref<1x128xf32, #tpu.memory_space<vmem>>, %arg4: memref<128x128xbf16, #tpu.memory_space<vmem>>, %arg5: memref<1x128xf32, #tpu.memory_space<vmem>>, %arg6: memref<128x128xbf16, #tpu.memory_space<vmem>>, %arg7: memref<1x128xf32, #tpu.memory_space<vmem>>, %arg8: memref<8x128xf32, #tpu.memory_space<vmem>>) attributes {dimension_semantics = [#tpu.dimension_semantics<parallel>], iteration_bounds = array<i64: 1>, scalar_prefetch = 0 : i64, scratch_operands = 0 : i64, tpu.core_type = #tpu.core_type<tc>, window_params = [{transform_indices = @transform_0, window_bounds = array<i64: 8, 800>}, {pipeline_mode = #tpu.pipeline_mode<synchronous>, transform_indices = @transform_1, window_bounds = array<i64: 800, 128>}, {pipeline_mode = #tpu.pipeline_mode<synchronous>, transform_indices = @transform_2, window_bounds = array<i64: 1, 128>}, {pipeline_mode = #tpu.pipeline_mode<synchronous>, transform_indices = @transform_3, window_bounds = array<i64: 128, 128>}, {pipeline_mode = #tpu.pipeline_mode<synchronous>, transform_indices = @transform_4, window_bounds = array<i64: 1, 128>}, {pipeline_mode = #tpu.pipeline_mode<synchronous>, transform_indices = @transform_5, window_bounds = array<i64: 128, 128>}, {pipeline_mode = #tpu.pipeline_mode<synchronous>, transform_indices = @transform_6, window_bounds = array<i64: 1, 128>}, {transform_indices = @transform_7, window_bounds = array<i64: 8, 128>}]} {
    %c0 = arith.constant 0 : index
    %c0_0 = arith.constant 0 : index
    %0 = vector.load %arg1[%c0, %c0_0] : memref<8x800xbf16, #tpu.memory_space<vmem>>, vector<8x800xbf16>
    %c0_1 = arith.constant 0 : index
    %c0_2 = arith.constant 0 : index
    %1 = vector.load %arg2[%c0_1, %c0_2] : memref<800x128xbf16, #tpu.memory_space<vmem>>, vector<800x128xbf16>
    %cst = arith.constant dense<0.000000e+00> : vector<8x128xf32>
    %2 = tpu.matmul %0, %1, %cst {dimension_numbers = #tpu.dot_dimension_numbers<[1], [0], [0], [1], [0, 0, 1, 1], [], []>} : vector<8x800xbf16>, vector<800x128xbf16>, vector<8x128xf32> -> vector<8x128xf32>
    %c0_3 = arith.constant 0 : index
    %c0_4 = arith.constant 0 : index
    %3 = vector.load %arg3[%c0_3, %c0_4] : memref<1x128xf32, #tpu.memory_space<vmem>>, vector<1x128xf32>
    %4 = vector.broadcast %3 : vector<1x128xf32> to vector<8x128xf32>
    %5 = arith.addf %2, %4 : vector<8x128xf32>
    %cst_5 = arith.constant 0.000000e+00 : f32
    %6 = vector.broadcast %cst_5 : f32 to vector<8x128xf32>
    %7 = arith.maximumf %5, %6 : vector<8x128xf32>
    %8 = arith.truncf %7 : vector<8x128xf32> to vector<8x128xbf16>
    %c0_6 = arith.constant 0 : index
    %c0_7 = arith.constant 0 : index
    %9 = vector.load %arg4[%c0_6, %c0_7] : memref<128x128xbf16, #tpu.memory_space<vmem>>, vector<128x128xbf16>
    %cst_8 = arith.constant dense<0.000000e+00> : vector<8x128xf32>
    %10 = tpu.matmul %8, %9, %cst_8 {dimension_numbers = #tpu.dot_dimension_numbers<[1], [0], [0], [1], [0, 0, 1, 1], [], []>} : vector<8x128xbf16>, vector<128x128xbf16>, vector<8x128xf32> -> vector<8x128xf32>
    %c0_9 = arith.constant 0 : index
    %c0_10 = arith.constant 0 : index
    %11 = vector.load %arg5[%c0_9, %c0_10] : memref<1x128xf32, #tpu.memory_space<vmem>>, vector<1x128xf32>
    %12 = vector.broadcast %11 : vector<1x128xf32> to vector<8x128xf32>
    %13 = arith.addf %10, %12 : vector<8x128xf32>
    %cst_11 = arith.constant 0.000000e+00 : f32
    %14 = vector.broadcast %cst_11 : f32 to vector<8x128xf32>
    %15 = arith.maximumf %13, %14 : vector<8x128xf32>
    %16 = arith.truncf %15 : vector<8x128xf32> to vector<8x128xbf16>
    %c0_12 = arith.constant 0 : index
    %c0_13 = arith.constant 0 : index
    %17 = vector.load %arg6[%c0_12, %c0_13] : memref<128x128xbf16, #tpu.memory_space<vmem>>, vector<128x128xbf16>
    %cst_14 = arith.constant dense<0.000000e+00> : vector<8x128xf32>
    %18 = tpu.matmul %16, %17, %cst_14 {dimension_numbers = #tpu.dot_dimension_numbers<[1], [0], [0], [1], [0, 0, 1, 1], [], []>} : vector<8x128xbf16>, vector<128x128xbf16>, vector<8x128xf32> -> vector<8x128xf32>
    %c0_15 = arith.constant 0 : index
    %c0_16 = arith.constant 0 : index
    %19 = vector.load %arg7[%c0_15, %c0_16] : memref<1x128xf32, #tpu.memory_space<vmem>>, vector<1x128xf32>
    %20 = vector.broadcast %19 : vector<1x128xf32> to vector<8x128xf32>
    %21 = arith.addf %18, %20 : vector<8x128xf32>
    %c0_17 = arith.constant 0 : index
    %c0_18 = arith.constant 0 : index
    %22 = vector.load %arg8[%c0_17, %c0_18] : memref<8x128xf32, #tpu.memory_space<vmem>>, vector<8x128xf32>
    tpu.vector_store %arg8[%c0_17, %c0_18], %21 {strides = array<i32>} : memref<8x128xf32, #tpu.memory_space<vmem>>, vector<8x128xf32>,
    return
  }
  func.func @transform_0(%arg0: i32) -> (i32, i32) {
    %c0_i32 = arith.constant 0 : i32
    %c0_i32_0 = arith.constant 0 : i32
    return %arg0, %c0_i32 : i32, i32
  }
  func.func @transform_1(%arg0: i32) -> (i32, i32) {
    %c0_i32 = arith.constant 0 : i32
    %c0_i32_0 = arith.constant 0 : i32
    %c0_i32_1 = arith.constant 0 : i32
    return %c0_i32, %c0_i32_0 : i32, i32
  }
  func.func @transform_2(%arg0: i32) -> (i32, i32) {
    %c0_i32 = arith.constant 0 : i32
    %c0_i32_0 = arith.constant 0 : i32
    %c0_i32_1 = arith.constant 0 : i32
    return %c0_i32, %c0_i32_0 : i32, i32
  }
  func.func @transform_3(%arg0: i32) -> (i32, i32) {
    %c0_i32 = arith.constant 0 : i32
    %c0_i32_0 = arith.constant 0 : i32
    %c0_i32_1 = arith.constant 0 : i32
    return %c0_i32, %c0_i32_0 : i32, i32
  }
  func.func @transform_4(%arg0: i32) -> (i32, i32) {
    %c0_i32 = arith.constant 0 : i32
    %c0_i32_0 = arith.constant 0 : i32
    %c0_i32_1 = arith.constant 0 : i32
    return %c0_i32, %c0_i32_0 : i32, i32
  }
  func.func @transform_5(%arg0: i32) -> (i32, i32) {
    %c0_i32 = arith.constant 0 : i32
    %c0_i32_0 = arith.constant 0 : i32
    %c0_i32_1 = arith.constant 0 : i32
    return %c0_i32, %c0_i32_0 : i32, i32
  }
  func.func @transform_6(%arg0: i32) -> (i32, i32) {
    %c0_i32 = arith.constant 0 : i32
    %c0_i32_0 = arith.constant 0 : i32
    %c0_i32_1 = arith.constant 0 : i32
    return %c0_i32, %c0_i32_0 : i32, i32
  }
  func.func @transform_7(%arg0: i32) -> (i32, i32) {
    %c0_i32 = arith.constant 0 : i32
    %c0_i32_0 = arith.constant 0 : i32
    return %arg0, %c0_i32 : i32, i32
  }
}

</mosaic_0001>

<bundles_post_ra>
// kernel: lenet_forward.3
= control target key start
LH: loop header
LB: loop body
LE: loop exit
PB: predicated region body
PF: predicated region fallthrough
CT: control target
= control target key end

     0   :  { %s1984_s12 = smov 0   ;;  %s1986_s13 = smov 0   ;;  %s2494_s0 = inlined_call_operand.vmem [shape: bf16[4,392,200], index: 0, kind: input, shape index: {}]   ;;  %s2495_s1 = inlined_call_operand.vmem [shape: bf16[200,128], index: 1, kind: input, shape index: {}]   ;;  %s2496_s2 = inlined_call_operand.vmem [shape: f32[1,128], index: 2, kind: input, shape index: {}]   ;;  %s2497_s3 = inlined_call_operand.vmem [shape: bf16[392,128], index: 3, kind: output, shape index: {}]  }
   0x1   :  { %s1988_s14 = smov 0   ;;  %s1990_s15 = smov 0  }
   0x2   :  { %s1992_s16 = smov 0   ;;  %s1994_s17 = smov 0  }
   0x3   :  { %s1996_s18 = smov 0  }
   0x4 LB: > { %s22_s19 = sadd.s32 1, %s1921_s16  ;;  %s25_s20 = sadd.s32 1, %s1925_s17  ;;  %s1929_s18 = sphi %s1996_s18, %s13_s18   ;;  %s1925_s17 = sphi %s1994_s17, %s2507_s17   ;;  %s1921_s16 = sphi %s1992_s16, %s2506_s16   ;;  %s1917_s15 = sphi %s1990_s15, %s2505_s15   ;;  %s1913_s14 = sphi %s1988_s14, %s2504_s14   ;;  %s1909_s13 = sphi %s1986_s13, %s2503_s13   ;;  %s1905_s12 = sphi %s1984_s12, %s2502_s12  }
   0x5   : > { %p23_p0 = scmp.ge.s32.totalorder %s22_s19, 4  ;;  %s1309_s21 = sadd.s32 4294967295, %s1929_s18  }
   0x6   : > { %p112_p1 = scmp.ne.s32.totalorder %s1909_s13, %s1905_s12  ;;  %p113_p2 = scmp.eq.s32.totalorder %s1309_s21, 7 }
   0x7   : > { %s2509_s19 = smov (%p23_p0, %s22_s19), 0  ;;  %s2511_s20 = smov (!%p23_p0, %s25_s20), %s1925_s17 }
   0x8   : > { %p1313_p3 = scmp.ge.s32.totalorder %s1929_s18, 1  ;;  %p27_p4 = scmp.ge.s32.totalorder %s2511_s20, 2 }
   0x9   : > { %p167_p5 = scmp.lt.s32.totalorder %s1929_s18, 9  ;;  %p2026_p6 = por %p113_p2, %p112_p1 }
   0xa   : > { %s2513_s20 = smov (%p27_p4, %s2511_s20), 0  ;;  %s102_s24 = sadd.s32 1, %s1909_s13 }
   0xb   : > { %p168_p7 = pnand %p1313_p3, %p167_p5  ;;  %s99_s23 = ssub.s32 %s1925_s17, %s2513_s20 }
   0xc   : > { %p100_p8 = scmp.eq.s32.totalorder %s99_s23, 0  ;;  %s197_s26 = sand.u32 (!%p168_p7), 1, %s1905_s12  }
   0xd   : > { %171 = sbr.rel (%p168_p7) target bundleno = 430 (0x1ae), region = 32  ;;  %p206_p9 = scmp.lt.s32.totalorder (!%p168_p7), %s1913_s14, 3 }
   0xe   : > { %s2036_s25 = scalar_select %p100_p8, %s1909_s13, %s102_s24  }
   0xf   : > { %s2038_s27 = smul.u32 (!%p168_p7), 100, %s197_s26  ;;  %p1369_p11 = scmp.ne.s32.totalorder (!%p168_p7), %s1913_s14, 0 }
  0x10   : > { %s2051_s5 = smul.u32 (!%p168_p7), 25, %s1917_s15 }
  0x12   : > { %v1963_v0 = vmov 0   ;;  %v1788_v1 = vld [vmem:[%s2495_s1 + $0x38] sm:$0xff]   ;;  %v1789_v2 = vld [vmem:[%s2495_s1 + $0x30] sm:$0xff]   ;;  %p208_p10 = scmp.lt.s32.totalorder %s2051_s5, 48  ;;  %v1790_v3 = vld [vmem:[%s2495_s1 + $0x28] sm:$0xff]   ;;  %vm473_vm0 = vcmask 588800  }
  0x13   : > { %517 = vmatprep.subr.bf16.mxu0 %v1963_v0  ;;  %1638 = vmatprep.subr.bf16.mxu1 %v1963_v0  ;;  %s207_s8 = scalar_select %p206_p9, %s1913_s14, 3  ;;  %v1791_v4 = vld [vmem:[%s2495_s1 + $0x20] sm:$0xff]   ;;  %v1792_v5 = vld [vmem:[%s2495_s1 + $0x18] sm:$0xff]   ;;  %v1793_v8 = vld [vmem:[%s2495_s1 + $0x10] sm:$0xff]   ;;  %vm513_vm1 = vcmask 1043456  }
  0x14   : > { %518 = vmatpush1.bf16.msra.mxu0 %v1788_v1  ;;  %1651 = vmatpush1.bf16.msra.mxu1 %v1788_v1  ;;  %s209_s9 = scalar_select %p208_p10, %s2051_s5, 48  ;;  %v1794_v9 = vld [vmem:[%s2495_s1 + $0x8] sm:$0xff]   ;;  %v1795_v10 = vld [vmem:[%s2495_s1] sm:$0xff]   ;;  %v1797_v13 = vld [vmem:[%s2495_s1 + $0x58] sm:$0xff]  }
  0x15   : > { %519 = vmatprep.subr.bf16.mxu0 %v1963_v0  ;;  %1639 = vmatprep.subr.bf16.mxu1 %v1963_v0  ;;  %s1665_s10 = smul.u32 98, %s207_s8  ;;  %v1796_v11 = vld [vmem:[%s2495_s1 + $0x60] ss:$0 sps:$4 sm:$0xff]   ;;  %v1798_v14 = vld [vmem:[%s2495_s1 + $0x50] sm:$0xff]   ;;  %v1799_v15 = vld [vmem:[%s2495_s1 + $0x48] sm:$0xff]  }
  0x16   : > { %s1314_s21 = sshll.u32 %s209_s9, 1  ;;  %v515_v12 = vsel %vm513_vm1, %v1796_v11, 0  ;;  %v1800_v16 = vld [vmem:[%s2495_s1 + $0x40] sm:$0xff]  }
  0x17   : > { %s212_s23 = sadd.s32 %s1665_s10, %s1314_s21  ;;  %v2158_v42 = vld [vmem:[%s2496_s2] ss:$0 sm:$0xff] }
  0x18   : > { %520 = vmatpush1.bf16.msra.mxu0 %v1789_v2  ;;  %1652 = vmatpush1.bf16.msra.mxu1 %v1789_v2  ;;  %s1315_s24 = sshll.u32 %s212_s23, 2 }
  0x19   : > { %521 = vmatprep.subr.bf16.mxu0 %v1963_v0  ;;  %1640 = vmatprep.subr.bf16.mxu1 %v1963_v0  ;;  %s2070_s29 = scalar_lea.vmem %s2494_s0, %s1315_s24 }
  0x1a   : > { %v1803_v6 = vld [vmem:[%s2070_s29 + $0x4] ss:$8 sps:$4 sm:$0xff]   ;;  %v1806_v7 = vld [vmem:[%s2070_s29 + $0x74] ss:$8 sps:$4 sm:$0xff]   ;;  %v1801_v17 = vld [vmem:[%s2070_s29] ss:$8 sps:$4 sm:$0xff]  }
  0x1b   : > { %1356 = vmatprep.mubr.msk.bf16.mxu0 %vm473_vm0, %v1803_v6  ;;  %1363 = vmatprep.mubr.msk.bf16.mxu1 %vm473_vm0, %v1806_v7  ;;  %v1804_v18 = vld [vmem:[%s2070_s29 + $0x70] ss:$8 sps:$4 sm:$0xff]   ;;  %v1807_v19 = vld [vmem:[%s2070_s29 + $0x14] ss:$8 sps:$4 sm:$0xff]   ;;  %v1810_v20 = vld [vmem:[%s2070_s29 + $0x84] ss:$8 sps:$4 sm:$0xff]  }
  0x1c   : > { %522 = vmatpush1.bf16.msra.mxu0 %v1790_v3  ;;  %1653 = vmatpush1.bf16.msra.mxu1 %v1790_v3  ;;  %v1809_v21 = vld [vmem:[%s2070_s29 + $0x10] ss:$8 sps:$4 sm:$0xff]   ;;  %v1812_v22 = vld [vmem:[%s2070_s29 + $0x80] ss:$8 sps:$4 sm:$0xff]   ;;  %v1813_v23 = vld [vmem:[%s2070_s29 + $0x24] ss:$8 sps:$4 sm:$0xff]  }
  0x1d   : > { %523 = vmatprep.subr.bf16.mxu0 %v1963_v0  ;;  %1641 = vmatprep.subr.bf16.mxu1 %v1963_v0  ;;  %v1816_v24 = vld [vmem:[%s2070_s29 + $0x94] ss:$8 sps:$4 sm:$0xff]   ;;  %v1815_v25 = vld [vmem:[%s2070_s29 + $0x20] ss:$8 sps:$4 sm:$0xff]   ;;  %v1818_v26 = vld [vmem:[%s2070_s29 + $0x90] ss:$8 sps:$4 sm:$0xff]  }
  0x1e   : > { %v1819_v27 = vld [vmem:[%s2070_s29 + $0x34] ss:$8 sps:$4 sm:$0xff]   ;;  %v1822_v28 = vld [vmem:[%s2070_s29 + $0xa4] ss:$8 sps:$4 sm:$0xff]   ;;  %v1821_v29 = vld [vmem:[%s2070_s29 + $0x30] ss:$8 sps:$4 sm:$0xff]  }
  0x1f   : > { %v1824_v30 = vld [vmem:[%s2070_s29 + $0xa0] ss:$8 sps:$4 sm:$0xff]   ;;  %v1825_v31 = vld [vmem:[%s2070_s29 + $0x44] ss:$8 sps:$4 sm:$0xff]   ;;  %v1828_v32 = vld [vmem:[%s2070_s29 + $0xb4] ss:$8 sps:$4 sm:$0xff]  }
  0x20   : > { %524 = vmatpush1.bf16.msra.mxu0 %v1791_v4  ;;  %1654 = vmatpush1.bf16.msra.mxu1 %v1791_v4  ;;  %v251_v33 = vld [vmem:[%s2070_s29 + $0xc0] sm:$0xff]  ;;  %v1830_v35 = vld [vmem:[%s2070_s29 + $0xb0] ss:$8 sps:$4 sm:$0xff]   ;;  %v1831_v36 = vld [vmem:[%s2070_s29 + $0x54] ss:$8 sps:$4 sm:$0xff]  }
  0x21   : > { %525 = vmatprep.subr.bf16.mxu0 %v1963_v0  ;;  %1642 = vmatprep.subr.bf16.mxu1 %v1963_v0  ;;  %v1827_v34 = vld [vmem:[%s2070_s29 + $0x40] ss:$8 sps:$4 sm:$0xff]   ;;  %v1342_v37 = vcombine.high %v251_v33, %v251_v33  ;;  %v1833_v38 = vld [vmem:[%s2070_s29 + $0x50] ss:$8 sps:$4 sm:$0xff]   ;;  %v1341_v39 = vcombine.low %v251_v33, %v251_v33  ;;  %v1836_v40 = vld [vmem:[%s2070_s29 + $0x64] ss:$8 sps:$4 sm:$0xff]  }
  0x22   : > { %v1838_v41 = vld [vmem:[%s2070_s29 + $0x60] ss:$8 sps:$4 sm:$0xff]   ;;  %s2236_s29 = scalar_lea.vmem [#allocation2], %s2038_s27  }
  0x24   : > { %526 = vmatpush1.bf16.msra.mxu0 %v1792_v5  ;;  %1655 = vmatpush1.bf16.msra.mxu1 %v1792_v5 }
  0x25   : > { %527 = vmatprep.subr.bf16.mxu0 %v1963_v0  ;;  %1643 = vmatprep.subr.bf16.mxu1 %v1963_v0 }
  0x28   : > { %528 = vmatpush1.bf16.msra.mxu0 %v1793_v8  ;;  %1656 = vmatpush1.bf16.msra.mxu1 %v1793_v8 }
  0x29   : > { %529 = vmatprep.subr.bf16.mxu0 %v1963_v0  ;;  %1644 = vmatprep.subr.bf16.mxu1 %v1963_v0 }
  0x2c   : > { %530 = vmatpush1.bf16.msra.mxu0 %v1794_v9  ;;  %1657 = vmatpush1.bf16.msra.mxu1 %v1794_v9 }
  0x2d   : > { %531 = vmatprep.subr.bf16.mxu0 %v1963_v0  ;;  %1645 = vmatprep.subr.bf16.mxu1 %v1963_v0 }
  0x30   : > { %532 = vmatpush1.bf16.msra.mxu0 %v1795_v10  ;;  %1658 = vmatpush1.bf16.msra.mxu1 %v1795_v10 }
  0x31   : > { %539 = vmatprep.subr.bf16.mxu0 %v1963_v0  ;;  %1646 = vmatprep.subr.bf16.mxu1 %v1963_v0 }
  0x34   : > { %540 = vmatpush2.bf16.msra.mxu0 %v515_v12  ;;  %1659 = vmatpush2.bf16.msra.mxu1 %v515_v12 }
  0x35   : > { %541 = vmatprep.subr.bf16.mxu0 %v1963_v0  ;;  %1647 = vmatprep.subr.bf16.mxu1 %v1963_v0 }
  0x38   : > { %542 = vmatpush2.bf16.msra.mxu0 %v1797_v13  ;;  %1660 = vmatpush2.bf16.msra.mxu1 %v1797_v13 }
  0x39   : > { %543 = vmatprep.subr.bf16.mxu0 %v1963_v0  ;;  %1648 = vmatprep.subr.bf16.mxu1 %v1963_v0 }
  0x3c   : > { %544 = vmatpush2.bf16.msra.mxu0 %v1798_v14  ;;  %1661 = vmatpush2.bf16.msra.mxu1 %v1798_v14 }
  0x3d   : > { %545 = vmatprep.subr.bf16.mxu0 %v1963_v0  ;;  %1649 = vmatprep.subr.bf16.mxu1 %v1963_v0 }
  0x40   : > { %546 = vmatpush2.bf16.msra.mxu0 %v1799_v15  ;;  %1662 = vmatpush2.bf16.msra.mxu1 %v1799_v15 }
  0x41   : > { %547 = vmatprep.subr.bf16.mxu0 %v1963_v0  ;;  %1650 = vmatprep.subr.bf16.mxu1 %v1963_v0 }
  0x44   : > { %548 = vmatpush2.bf16.msra.mxu0 %v1800_v16  ;;  %1663 = vmatpush2.bf16.msra.mxu1 %v1800_v16 }
  0x47   : > { %550 = vmatmul.mubr.bf16.vlgmr.msra.gmra.mxu0 %v1801_v17  ;;  %606 = vmatmul.mubr.bf16.vlgmr.msra.gmra.mxu1 %v1804_v18 }
  0x48   : > { %1357 = vmatprep.mubr.msk.bf16.mxu0 %vm473_vm0, %v1807_v19  ;;  %1364 = vmatprep.mubr.msk.bf16.mxu1 %vm473_vm0, %v1810_v20 }
  0x4f   : > { %558 = vmatmul.mubr.bf16.gmra.mxu0 %v1809_v21  ;;  %614 = vmatmul.mubr.bf16.gmra.mxu1 %v1812_v22 }
  0x50   : > { %1358 = vmatprep.mubr.msk.bf16.mxu0 %vm473_vm0, %v1813_v23  ;;  %1365 = vmatprep.mubr.msk.bf16.mxu1 %vm473_vm0, %v1816_v24 }
  0x57   : > { %566 = vmatmul.mubr.bf16.gmra.mxu0 %v1815_v25  ;;  %622 = vmatmul.mubr.bf16.gmra.mxu1 %v1818_v26 }
  0x58   : > { %1359 = vmatprep.mubr.msk.bf16.mxu0 %vm473_vm0, %v1819_v27  ;;  %1366 = vmatprep.mubr.msk.bf16.mxu1 %vm473_vm0, %v1822_v28 }
  0x5f   : > { %574 = vmatmul.mubr.bf16.gmra.mxu0 %v1821_v29  ;;  %630 = vmatmul.mubr.bf16.gmra.mxu1 %v1824_v30 }
  0x60   : > { %1360 = vmatprep.mubr.msk.bf16.mxu0 %vm473_vm0, %v1825_v31  ;;  %1367 = vmatprep.mubr.msk.bf16.mxu1 %vm473_vm0, %v1828_v32 }
  0x67   : > { %582 = vmatmul.mubr.bf16.gmra.mxu0 %v1827_v34  ;;  %638 = vmatmul.mubr.bf16.gmra.mxu1 %v1830_v35 }
  0x68   : > { %1361 = vmatprep.mubr.msk.bf16.mxu0 %vm473_vm0, %v1831_v36  ;;  %1368 = vmatprep.mubr.msk.bf16.mxu1 %vm473_vm0, %v1342_v37 }
  0x6f   : > { %590 = vmatmul.mubr.bf16.gmra.mxu0 %v1833_v38  ;;  %646 = vmatmul.mubr.bf16.gmra.mxu1 %v1341_v39 }
  0x70   : > { %1362 = vmatprep.mubr.msk.bf16.mxu0 %vm473_vm0, %v1836_v40 }
  0x77   : > { %598 = vmatmul.mubr.bf16.gmra.mxu0 %v1838_v41 }
 0x107   : > { %v551_v43 = vpop.f32.mrf.mxu0  ;;  %v607_v44 = vpop.f32.mrf.mxu1 }
 0x108   : > { %v552_v45 = vadd.f32 %v2158_v42, %v551_v43  ;;  %v608_v46 = vadd.f32 %v2158_v42, %v607_v44 }
 0x109   : > { %v553_v47 = vpop.f32.mrf.mxu0  ;;  %v609_v48 = vpop.f32.mrf.mxu1 }
 0x10a   : > { %v2162_v49 = vmax.f32 %v552_v45, 0.0  ;;  %v2164_v50 = vmax.f32 %v608_v46, 0.0 }
 0x10b   : > { %v554_v51 = vpop.f32.mrf.mxu0  ;;  %v610_v52 = vpop.f32.mrf.mxu1 }
 0x10c   : > { %v555_v53 = vadd.f32 %v2158_v42, %v554_v51  ;;  %v611_v54 = vadd.f32 %v2158_v42, %v610_v52 }
 0x10d   : > { %v556_v55 = vpop.f32.mrf.mxu0  ;;  %v612_v56 = vpop.f32.mrf.mxu1 }
 0x10e   : > { %v2168_v57 = vmax.f32 %v555_v53, 0.0  ;;  %v2170_v58 = vmax.f32 %v611_v54, 0.0 }
 0x10f   : > { %v559_v59 = vpop.f32.mrf.mxu0  ;;  %v615_v60 = vpop.f32.mrf.mxu1 }
 0x110   : > { %v560_v61 = vadd.f32 %v2158_v42, %v559_v59  ;;  %v616_v62 = vadd.f32 %v2158_v42, %v615_v60 }
 0x111   : > { %v561_v63 = vpop.f32.mrf.mxu0  ;;  %v617_v0 = vpop.f32.mrf.mxu1 }
 0x112   : > { %v2174_v1 = vmax.f32 %v560_v61, 0.0  ;;  %v2176_v2 = vmax.f32 %v616_v62, 0.0 }
 0x113   : > { %v562_v3 = vpop.f32.mrf.mxu0  ;;  %v618_v4 = vpop.f32.mrf.mxu1 }
 0x114   : > { %v563_v5 = vadd.f32 %v2158_v42, %v562_v3  ;;  %v619_v6 = vadd.f32 %v2158_v42, %v618_v4 }
 0x115   : > { %v564_v7 = vpop.f32.mrf.mxu0  ;;  %v620_v8 = vpop.f32.mrf.mxu1 }
 0x116   : > { %v2180_v9 = vmax.f32 %v563_v5, 0.0  ;;  %v2182_v10 = vmax.f32 %v619_v6, 0.0 }
 0x117   : > { %v567_v11 = vpop.f32.mrf.mxu0  ;;  %v623_v12 = vpop.f32.mrf.mxu1 }
 0x118   : > { %v568_v13 = vadd.f32 %v2158_v42, %v567_v11  ;;  %v624_v14 = vadd.f32 %v2158_v42, %v623_v12 }
 0x119   : > { %v569_v15 = vpop.f32.mrf.mxu0  ;;  %v625_v16 = vpop.f32.mrf.mxu1 }
 0x11a   : > { %v2186_v17 = vmax.f32 %v568_v13, 0.0  ;;  %v2188_v18 = vmax.f32 %v624_v14, 0.0 }
 0x11b   : > { %v570_v19 = vpop.f32.mrf.mxu0  ;;  %v626_v20 = vpop.f32.mrf.mxu1 }
 0x11c   : > { %v571_v21 = vadd.f32 %v2158_v42, %v570_v19  ;;  %v627_v22 = vadd.f32 %v2158_v42, %v626_v20 }
 0x11d   : > { %v572_v23 = vpop.f32.mrf.mxu0  ;;  %v628_v24 = vpop.f32.mrf.mxu1 }
 0x11e   : > { %v2192_v25 = vmax.f32 %v571_v21, 0.0  ;;  %v2194_v26 = vmax.f32 %v627_v22, 0.0 }
 0x11f   : > { %v575_v27 = vpop.f32.mrf.mxu0  ;;  %v631_v28 = vpop.f32.mrf.mxu1 }
 0x120   : > { %v576_v29 = vadd.f32 %v2158_v42, %v575_v27  ;;  %v632_v30 = vadd.f32 %v2158_v42, %v631_v28 }
 0x121   : > { %v577_v31 = vpop.f32.mrf.mxu0  ;;  %v633_v32 = vpop.f32.mrf.mxu1 }
 0x122   : > { %v2198_v33 = vmax.f32 %v576_v29, 0.0  ;;  %v2200_v34 = vmax.f32 %v632_v30, 0.0 }
 0x123   : > { %v578_v35 = vpop.f32.mrf.mxu0  ;;  %v634_v36 = vpop.f32.mrf.mxu1 }
 0x124   : > { %v579_v37 = vadd.f32 %v2158_v42, %v578_v35  ;;  %v635_v38 = vadd.f32 %v2158_v42, %v634_v36 }
 0x125   : > { %v580_v39 = vpop.f32.mrf.mxu0  ;;  %v636_v40 = vpop.f32.mrf.mxu1 }
 0x126   : > { %v2204_v41 = vmax.f32 %v579_v37, 0.0  ;;  %v2206_v43 = vmax.f32 %v635_v38, 0.0 }
 0x127   : > { %v583_v44 = vpop.f32.mrf.mxu0  ;;  %v639_v45 = vpop.f32.mrf.mxu1 }
 0x128   : > { %v584_v46 = vadd.f32 %v2158_v42, %v583_v44  ;;  %v640_v47 = vadd.f32 %v2158_v42, %v639_v45 }
 0x129   : > { %v585_v48 = vpop.f32.mrf.mxu0  ;;  %v641_v51 = vpop.f32.mrf.mxu1 }
 0x12a   : > { %v2210_v52 = vmax.f32 %v584_v46, 0.0  ;;  %v2212_v53 = vmax.f32 %v640_v47, 0.0 }
 0x12b   : > { %v586_v54 = vpop.f32.mrf.mxu0  ;;  %v642_v55 = vpop.f32.mrf.mxu1 }
 0x12c   : > { %v587_v56 = vadd.f32 %v2158_v42, %v586_v54  ;;  %v643_v59 = vadd.f32 %v2158_v42, %v642_v55 }
 0x12d   : > { %v588_v60 = vpop.f32.mrf.mxu0  ;;  %v644_v61 = vpop.f32.mrf.mxu1 }
 0x12e   : > { %v2216_v62 = vmax.f32 %v587_v56, 0.0  ;;  %v2218_v63 = vmax.f32 %v643_v59, 0.0 }
 0x12f   : > { %v591_v0 = vpop.f32.mrf.mxu0  ;;  %v647_v3 = vpop.f32.mrf.mxu1 }
 0x130   : > { %v592_v4 = vadd.f32 %v2158_v42, %v591_v0  ;;  %v648_v5 = vadd.f32 %v2158_v42, %v647_v3 }
 0x131   : > { %v593_v6 = vpop.f32.mrf.mxu0  ;;  %v649_v7 = vpop.f32.mrf.mxu1 }
 0x132   : > { %v2222_v8 = vmax.f32 %v592_v4, 0.0  ;;  %v2224_v11 = vmax.f32 %v648_v5, 0.0 }
 0x133   : > { %v594_v12 = vpop.f32.mrf.mxu0  ;;  %v650_v13 = vpop.f32.mrf.mxu1 }
 0x134   : > { %v595_v14 = vadd.f32 %v2158_v42, %v594_v12 }
 0x135   : > { %v596_v15 = vpop.f32.mrf.mxu0  ;;  %v651_v16 = vpop.f32.mrf.mxu1 }
 0x136   : > { %v2227_v19 = vmax.f32 %v595_v14, 0.0 }
 0x137   : > { %v599_v20 = vpop.f32.mrf.mxu0 }
 0x138   : > { %v600_v21 = vadd.f32 %v2158_v42, %v599_v20 }
 0x139   : > { %v601_v22 = vpop.f32.mrf.mxu0 }
 0x13a   : > { %v2230_v23 = vmax.f32 %v600_v21, 0.0  ;;  %694 = sbr.rel (%p1369_p11) target bundleno = 328 (0x148), region = 36 }
 0x13b   : > { %v602_v24 = vpop.f32.mrf.mxu0 }
 0x13c   : > { %v603_v27 = vadd.f32 %v2158_v42, %v602_v24 }
 0x13d   : > { %v604_v28 = vpop.f32.mrf.mxu0 }
 0x13e   : > { %v2233_v29 = vmax.f32 %v603_v27, 0.0 }
 0x13f   : > { %v1487_v30 = vpack.c.bf16 %v2168_v57, %v2162_v49  ;;  %v1492_v31 = vpack.c.bf16 %v2180_v9, %v2174_v1  ;;  %v1497_v42 = vpack.c.bf16 %v2192_v25, %v2186_v17  ;;  %v1502_v32 = vpack.c.bf16 %v2204_v41, %v2198_v33 }
 0x140   : > { %v1507_v35 = vpack.c.bf16 %v2216_v62, %v2210_v52  ;;  %v1512_v36 = vpack.c.bf16 %v2227_v19, %v2222_v8  ;;  %v1517_v37 = vpack.c.bf16 %v2233_v29, %v2230_v23  ;;  %v1522_v38 = vpack.c.bf16 %v2170_v58, %v2164_v50 }
 0x141   : > { %1488 = vst [vmem:[%s2236_s29] sm:$0xff] %v1487_v30   ;;  %1604 = vst [vmem:[%s2236_s29 + $0x8] sm:$0xff] %v1492_v31   ;;  %v1527_v39 = vpack.c.bf16 %v2182_v10, %v2176_v2  ;;  %v1532_v40 = vpack.c.bf16 %v2194_v26, %v2188_v18  ;;  %v1537_v44 = vpack.c.bf16 %v2206_v43, %v2200_v34 }
 0x142   : > { %1605 = vst [vmem:[%s2236_s29 + $0x10] sm:$0xff] %v1497_v42   ;;  %1606 = vst [vmem:[%s2236_s29 + $0x18] sm:$0xff] %v1502_v32   ;;  %v1542_v45 = vpack.c.bf16 %v2218_v63, %v2212_v53  ;;  %v1457_v46 = vpack.c.bf16 %v2224_v11, %v2224_v11 }
 0x143   : > { %1607 = vst [vmem:[%s2236_s29 + $0x20] sm:$0xff] %v1507_v35   ;;  %1608 = vst [vmem:[%s2236_s29 + $0x28] sm:$0xff] %v1512_v36  }
 0x144   : > { %1609 = vst [vmem:[%s2236_s29 + $0x30] sm:$0xff] %v1517_v37   ;;  %1610 = vst [vmem:[%s2236_s29 + $0x38] sm:$0xff] %v1522_v38  }
 0x145   : > { %1611 = vst [vmem:[%s2236_s29 + $0x40] sm:$0xff] %v1527_v39   ;;  %1612 = vst [vmem:[%s2236_s29 + $0x48] sm:$0xff] %v1532_v40  }
 0x146   : > { %1613 = vst [vmem:[%s2236_s29 + $0x50] sm:$0xff] %v1537_v44   ;;  %1614 = vst [vmem:[%s2236_s29 + $0x58] sm:$0xff] %v1542_v45  }
 0x147   : > { %807 = vst [vmem:[%s2236_s29 + $0x60] sm:$0xf] %v1457_v46 }
 0x148 PF: > { %p1395_p12 = scmp.le.s32.totalorder %s1913_s14, 0 }
 0x14a   : > { %811 = sbr.rel (%p1395_p12) target bundleno = 355 (0x163), region = 40 }
 0x14f   : > { %v812_v47 = vld [vmem:[%s2236_s29] sm:$0xf]  ;;  %v813_v48 = vld [vmem:[%s2236_s29 + $0x4] sm:$0xf]  ;;  %v1458_v51 = vpack.c.bf16 %v2162_v49, %v2162_v49  ;;  %v1459_v54 = vpack.c.bf16 %v2168_v57, %v2168_v57  ;;  %v814_v55 = vld [vmem:[%s2236_s29 + $0x8] sm:$0xf]  ;;  %v1460_v56 = vpack.c.bf16 %v2174_v1, %v2174_v1  ;;  %v1461_v59 = vpack.c.bf16 %v2180_v9, %v2180_v9 }
 0x150   : > { %v815_v60 = vld [vmem:[%s2236_s29 + $0xc] sm:$0xf]  ;;  %v816_v61 = vld [vmem:[%s2236_s29 + $0x10] sm:$0xf]  ;;  %v817_v0 = vld [vmem:[%s2236_s29 + $0x14] sm:$0xf]  ;;  %v1462_v49 = vpack.c.bf16 %v2186_v17, %v2186_v17  ;;  %v1463_v3 = vpack.c.bf16 %v2192_v25, %v2192_v25  ;;  %v1464_v57 = vpack.c.bf16 %v2198_v33, %v2198_v33  ;;  %v1465_v1 = vpack.c.bf16 %v2204_v41, %v2204_v41 }
 0x151   : > { %v925_v4 = vmax.bf16 %v1458_v51, %v812_v47  ;;  %v926_v9 = vmax.bf16 %v1459_v54, %v813_v48  ;;  %v927_v5 = vmax.bf16 %v1460_v56, %v814_v55  ;;  %v928_v6 = vmax.bf16 %v1461_v59, %v815_v60  ;;  %v818_v7 = vld [vmem:[%s2236_s29 + $0x18] sm:$0xf]  ;;  %v819_v12 = vld [vmem:[%s2236_s29 + $0x1c] sm:$0xf]  ;;  %v820_v33 = vld [vmem:[%s2236_s29 + $0x20] sm:$0xf] }
 0x152   : > { %v929_v13 = vmax.bf16 %v1462_v49, %v816_v61  ;;  %v930_v17 = vmax.bf16 %v1463_v3, %v817_v0  ;;  %v931_v14 = vmax.bf16 %v1464_v57, %v818_v7  ;;  %v932_v25 = vmax.bf16 %v1465_v1, %v819_v12  ;;  %v821_v15 = vld [vmem:[%s2236_s29 + $0x24] sm:$0xf]  ;;  %v822_v22 = vld [vmem:[%s2236_s29 + $0x28] sm:$0xf]  ;;  %v823_v24 = vld [vmem:[%s2236_s29 + $0x2c] sm:$0xf] }
 0x153   : > { %v1615_v16 = vcombine.low %v925_v4, %v926_v9  ;;  %v1616_v41 = vcombine.low %v927_v5, %v928_v6  ;;  %v1466_v20 = vpack.c.bf16 %v2210_v52, %v2210_v52  ;;  %v1467_v21 = vpack.c.bf16 %v2216_v62, %v2216_v62  ;;  %v824_v42 = vld [vmem:[%s2236_s29 + $0x30] sm:$0xf]  ;;  %v825_v52 = vld [vmem:[%s2236_s29 + $0x34] sm:$0xf]  ;;  %v826_v37 = vld [vmem:[%s2236_s29 + $0x38] sm:$0xf] }
 0x154   : > { %v1618_v27 = vcombine.low %v929_v13, %v930_v17  ;;  %v1620_v28 = vcombine.low %v931_v14, %v932_v25  ;;  %v1468_v30 = vpack.c.bf16 %v2222_v8, %v2222_v8  ;;  %v1469_v31 = vpack.c.bf16 %v2227_v19, %v2227_v19  ;;  %v827_v38 = vld [vmem:[%s2236_s29 + $0x3c] sm:$0xf]  ;;  %v828_v44 = vld [vmem:[%s2236_s29 + $0x40] sm:$0xf]  ;;  %v829_v46 = vld [vmem:[%s2236_s29 + $0x44] sm:$0xf] }
 0x155   : > { %1548 = vst [vmem:[%s2236_s29] sm:$0xff] %v1615_v16   ;;  %1617 = vst [vmem:[%s2236_s29 + $0x8] sm:$0xff] %v1616_v41   ;;  %v933_v32 = vmax.bf16 %v1466_v20, %v820_v33  ;;  %v934_v62 = vmax.bf16 %v1467_v21, %v821_v15  ;;  %v1470_v35 = vpack.c.bf16 %v2230_v23, %v2230_v23  ;;  %v831_v55 = vld [vmem:[%s2236_s29 + $0x4c] sm:$0xf]  ;;  %v832_v61 = vld [vmem:[%s2236_s29 + $0x50] sm:$0xf] }
 0x156   : > { %v1471_v36 = vpack.c.bf16 %v2233_v29, %v2233_v29  ;;  %1619 = vst [vmem:[%s2236_s29 + $0x10] sm:$0xff] %v1618_v27   ;;  %1621 = vst [vmem:[%s2236_s29 + $0x18] sm:$0xff] %v1620_v28   ;;  %v935_v8 = vmax.bf16 %v1468_v30, %v822_v22  ;;  %v936_v19 = vmax.bf16 %v1469_v31, %v823_v24  ;;  %v833_v0 = vld [vmem:[%s2236_s29 + $0x54] sm:$0xf]  ;;  %v834_v1 = vld [vmem:[%s2236_s29 + $0x58] sm:$0xf] }
 0x157   : > { %v1472_v39 = vpack.c.bf16 %v2164_v50, %v2164_v50  ;;  %v1473_v40 = vpack.c.bf16 %v2170_v58, %v2170_v58  ;;  %v1622_v23 = vcombine.low %v933_v32, %v934_v62  ;;  %v937_v45 = vmax.bf16 %v1470_v35, %v824_v42  ;;  %v830_v58 = vld [vmem:[%s2236_s29 + $0x48] sm:$0xf]  ;;  %v835_v4 = vld [vmem:[%s2236_s29 + $0x5c] sm:$0xf]  ;;  %v836_v6 = vld [vmem:[%s2236_s29 + $0x60] sm:$0xf] }
 0x158   : > { %v938_v29 = vmax.bf16 %v1471_v36, %v825_v52  ;;  %v1474_v47 = vpack.c.bf16 %v2176_v2, %v2176_v2  ;;  %v1624_v48 = vcombine.low %v935_v8, %v936_v19  ;;  %v1475_v50 = vpack.c.bf16 %v2182_v10, %v2182_v10 }
 0x159   : > { %v939_v51 = vmax.bf16 %v1472_v39, %v826_v37  ;;  %v940_v54 = vmax.bf16 %v1473_v40, %v827_v38  ;;  %1623 = vst [vmem:[%s2236_s29 + $0x20] sm:$0xff] %v1622_v23   ;;  %v1476_v60 = vpack.c.bf16 %v2188_v18, %v2188_v18  ;;  %v1477_v2 = vpack.c.bf16 %v2194_v26, %v2194_v26 }
 0x15a   : > { %v1626_v56 = vcombine.low %v937_v45, %v938_v29  ;;  %v941_v59 = vmax.bf16 %v1474_v47, %v828_v44  ;;  %1625 = vst [vmem:[%s2236_s29 + $0x28] sm:$0xff] %v1624_v48   ;;  %v942_v10 = vmax.bf16 %v1475_v50, %v829_v46  ;;  %v1478_v3 = vpack.c.bf16 %v2200_v34, %v2200_v34 }
 0x15b   : > { %v1628_v49 = vcombine.low %v939_v51, %v940_v54  ;;  %v1479_v57 = vpack.c.bf16 %v2206_v43, %v2206_v43  ;;  %v943_v18 = vmax.bf16 %v1476_v60, %v830_v58  ;;  %v944_v9 = vmax.bf16 %v1477_v2, %v831_v55 }
 0x15c   : > { %1627 = vst [vmem:[%s2236_s29 + $0x30] sm:$0xff] %v1626_v56   ;;  %v1480_v26 = vpack.c.bf16 %v2212_v53, %v2212_v53  ;;  %v1481_v5 = vpack.c.bf16 %v2218_v63, %v2218_v63  ;;  %v1630_v34 = vcombine.low %v941_v59, %v942_v10  ;;  %v945_v43 = vmax.bf16 %v1478_v3, %v832_v61 }
 0x15d   : > { %1629 = vst [vmem:[%s2236_s29 + $0x38] sm:$0xff] %v1628_v49   ;;  %v946_v7 = vmax.bf16 %v1479_v57, %v833_v0  ;;  %v1482_v12 = vpack.c.bf16 %v2224_v11, %v2224_v11  ;;  %v1632_v13 = vcombine.low %v943_v18, %v944_v9 }
 0x15e   : > { %v947_v17 = vmax.bf16 %v1480_v26, %v834_v1  ;;  %v948_v14 = vmax.bf16 %v1481_v5, %v835_v4  ;;  %1631 = vst [vmem:[%s2236_s29 + $0x40] sm:$0xff] %v1630_v34  }
 0x15f   : > { %v1634_v25 = vcombine.low %v945_v43, %v946_v7  ;;  %v949_v53 = vmax.bf16 %v1482_v12, %v836_v6  ;;  %1633 = vst [vmem:[%s2236_s29 + $0x48] sm:$0xff] %v1632_v13  }
 0x160   : > { %v1636_v33 = vcombine.low %v947_v17, %v948_v14 }
 0x161   : > { %1635 = vst [vmem:[%s2236_s29 + $0x50] sm:$0xff] %v1634_v25   ;;  %974 = vst [vmem:[%s2236_s29 + $0x60] sm:$0xf] %v949_v53 }
 0x162   : > { %1637 = vst [vmem:[%s2236_s29 + $0x58] sm:$0xff] %v1636_v33  }
 0x163 PF: > { %981 = sbr.rel (!%p2026_p6) target bundleno = 430 (0x1ae), region = 44  ;;  %s983_s14 = ssub.s32 (%p2026_p6), 49, %s2051_s5 }
 0x164   : > { %s1483_s27 = smul.u32 (%p2026_p6), 100, %s1917_s15  ;;  %p984_p13 = scmp.lt.s32.totalorder (%p2026_p6), %s983_s14, 25 }
 0x166   : > { %s2374_s12 = scalar_lea.vmem (%p2026_p6), %s2497_s3, %s1483_s27  }
 0x168   : > { %s2515_s14 = smov (!%p984_p13, %s983_s14), 25 }
 0x169   : > { %s1421_s21 = sshll.u32 %s2515_s14, 6 }
 0x16a   : > { %p1424_p0 = scmp.eq.s32.totalorder %s1421_s21, 0 }
 0x16b   : > { %1839 = sdivrem.u32 (!%p1424_p0), %s2515_s14, 25 }
 0x16c   : > { %992 = sbr.rel (%p1424_p0) target bundleno = 430 (0x1ae), region = 48 }
 0x174   : > { %s2380_s22 = spop.drf %1839 }
 0x175   : > { %p1425_p1 = scmp.le.s32.totalorder %s2380_s22, 0 }
 0x176   : > { %s2499_s15 = smov (!%p1425_p1), %s2374_s12  ;;  %s2500_s5 = smov (!%p1425_p1), %s2236_s29 }
 0x177   : > { %1254 = sbr.rel (%p1425_p1) target bundleno = 405 (0x195), region = 120  ;;  %s2389_s23 = smov (!%p1425_p1), 0  }
 0x178   : > { %s2391_s24 = smov (!%p1425_p1), 0  }
 0x17c LB: >> { %v1010_v63 = vld [vmem:[%s1937_s5] sm:$0xf]  ;;  %v1012_v11 = vld [vmem:[%s1937_s5 + $0x4] sm:$0xf]  ;;  %v1014_v15 = vld [vmem:[%s1937_s5 + $0x8] sm:$0xf]  ;;  %s1945_s24 = sphi %s2391_s24, %s1004_s24   ;;  %s1941_s23 = sphi %s2389_s23, %s2501_s23   ;;  %s1937_s5 = sphi %s2500_s5, %s1065_s5   ;;  %s1933_s15 = sphi %s2499_s15, %s1066_s15  }
 0x17d   : >> { %1011 = vst [vmem:[%s1933_s15] sm:$0xf] %v1010_v63  ;;  %1013 = vst [vmem:[%s1933_s15 + $0x4] sm:$0xf] %v1012_v11  ;;  %v1016_v16 = vld [vmem:[%s1937_s5 + $0xc] sm:$0xf]  ;;  %s1060_s26 = sadd.s32 1, %s1941_s23 }
 0x17e   : >> { %1015 = vst [vmem:[%s1933_s15 + $0x8] sm:$0xf] %v1014_v15  ;;  %v1018_v41 = vld [vmem:[%s1937_s5 + $0x10] sm:$0xf]  ;;  %v1020_v20 = vld [vmem:[%s1937_s5 + $0x14] sm:$0xf]  ;;  %p1061_p2 = scmp.ge.s32.totalorder %s1060_s26, %s2380_s22 }
 0x17f   : >> { %1017 = vst [vmem:[%s1933_s15 + $0xc] sm:$0xf] %v1016_v16  ;;  %1019 = vst [vmem:[%s1933_s15 + $0x10] sm:$0xf] %v1018_v41  ;;  %v1022_v21 = vld [vmem:[%s1937_s5 + $0x18] sm:$0xf] }
 0x180   : >> { %1021 = vst [vmem:[%s1933_s15 + $0x14] sm:$0xf] %v1020_v20  ;;  %v1024_v22 = vld [vmem:[%s1937_s5 + $0x1c] sm:$0xf]  ;;  %v1026_v24 = vld [vmem:[%s1937_s5 + $0x20] sm:$0xf] }
 0x181   : >> { %1023 = vst [vmem:[%s1933_s15 + $0x18] sm:$0xf] %v1022_v21  ;;  %1025 = vst [vmem:[%s1933_s15 + $0x1c] sm:$0xf] %v1024_v22  ;;  %v1028_v27 = vld [vmem:[%s1937_s5 + $0x24] sm:$0xf] }
 0x182   : >> { %1027 = vst [vmem:[%s1933_s15 + $0x20] sm:$0xf] %v1026_v24  ;;  %v1030_v28 = vld [vmem:[%s1937_s5 + $0x28] sm:$0xf]  ;;  %v1032_v30 = vld [vmem:[%s1937_s5 + $0x2c] sm:$0xf] }
 0x183   : >> { %1029 = vst [vmem:[%s1933_s15 + $0x24] sm:$0xf] %v1028_v27  ;;  %1031 = vst [vmem:[%s1933_s15 + $0x28] sm:$0xf] %v1030_v28  ;;  %v1034_v31 = vld [vmem:[%s1937_s5 + $0x30] sm:$0xf] }
 0x184   : >> { %1033 = vst [vmem:[%s1933_s15 + $0x2c] sm:$0xf] %v1032_v30  ;;  %v1036_v42 = vld [vmem:[%s1937_s5 + $0x34] sm:$0xf]  ;;  %v1038_v52 = vld [vmem:[%s1937_s5 + $0x38] sm:$0xf] }
 0x185   : >> { %1035 = vst [vmem:[%s1933_s15 + $0x30] sm:$0xf] %v1034_v31  ;;  %1037 = vst [vmem:[%s1933_s15 + $0x34] sm:$0xf] %v1036_v42  ;;  %v1040_v32 = vld [vmem:[%s1937_s5 + $0x3c] sm:$0xf] }
 0x186   : >> { %1039 = vst [vmem:[%s1933_s15 + $0x38] sm:$0xf] %v1038_v52  ;;  %v1042_v62 = vld [vmem:[%s1937_s5 + $0x40] sm:$0xf]  ;;  %v1044_v35 = vld [vmem:[%s1937_s5 + $0x44] sm:$0xf] }
 0x187   : >> { %1041 = vst [vmem:[%s1933_s15 + $0x3c] sm:$0xf] %v1040_v32  ;;  %1043 = vst [vmem:[%s1933_s15 + $0x40] sm:$0xf] %v1042_v62  ;;  %v1046_v36 = vld [vmem:[%s1937_s5 + $0x48] sm:$0xf] }
 0x188   : >> { %1045 = vst [vmem:[%s1933_s15 + $0x44] sm:$0xf] %v1044_v35  ;;  %v1048_v37 = vld [vmem:[%s1937_s5 + $0x4c] sm:$0xf]  ;;  %v1050_v38 = vld [vmem:[%s1937_s5 + $0x50] sm:$0xf] }
 0x189   : >> { %1047 = vst [vmem:[%s1933_s15 + $0x48] sm:$0xf] %v1046_v36  ;;  %1049 = vst [vmem:[%s1933_s15 + $0x4c] sm:$0xf] %v1048_v37  ;;  %v1052_v8 = vld [vmem:[%s1937_s5 + $0x54] sm:$0xf] }
 0x18a   : >> { %1051 = vst [vmem:[%s1933_s15 + $0x50] sm:$0xf] %v1050_v38  ;;  %v1054_v19 = vld [vmem:[%s1937_s5 + $0x58] sm:$0xf]  ;;  %v1056_v39 = vld [vmem:[%s1937_s5 + $0x5c] sm:$0xf] }
 0x18b   : >> { %1053 = vst [vmem:[%s1933_s15 + $0x54] sm:$0xf] %v1052_v8  ;;  %1055 = vst [vmem:[%s1933_s15 + $0x58] sm:$0xf] %v1054_v19  ;;  %v1058_v40 = vld [vmem:[%s1937_s5 + $0x60] sm:$0xf] }
 0x18c   : >> { %1057 = vst [vmem:[%s1933_s15 + $0x5c] sm:$0xf] %v1056_v39  ;;  %1059 = vst [vmem:[%s1933_s15 + $0x60] sm:$0xf] %v1058_v40  ;;  %s2517_s26 = smov (%p1061_p2, %s1060_s26), 0  ;;  %s1004_s24 = sadd.s32 1, %s1945_s24  }
 0x18d   : >> { %s1063_s28 = smul.u32 100, %s2517_s26  ;;  %p1003_p3 = scmp.ge.s32.totalorder %s1004_s24, %s2380_s22 }
 0x18e   : >> { %s2501_s23 = smov %s2517_s26 }
 0x18f   : >> { %s1065_s5 = scalar_lea.vmem %s2236_s29, %s1063_s28 [#allocation2]   ;;  %s1066_s15 = scalar_lea.vmem %s2374_s12, %s1063_s28  }
 0x190   : > { %1006 = sbr.rel (!%p1003_p3) target bundleno = 380 (0x17c), region = 126 }
 0x195 PF: > { %1841 = sdivrem.u32 %s2515_s14, 25 }
 0x196   : > { %s1426_s30 = smul.u32 100, %s2380_s22 }
 0x198   : > { %s1071_s4 = scalar_lea.vmem %s2236_s29, %s1426_s30 [#allocation2]   ;;  %s1073_s6 = scalar_lea.vmem %s2374_s12, %s1426_s30  }
 0x19e   : > { %s1842_s7 = spop.drf %1841 }
 0x19f   : > { %p1428_p4 = scmp.le.s32.totalorder %s1842_s7, 0 }
 0x1a0   : > { %s1947_s8 = smov (!%p1428_p4), %s1073_s6   ;;  %s1951_s9 = smov (!%p1428_p4), %s1071_s4  }
 0x1a1   : > { %1268 = sbr.rel (%p1428_p4) target bundleno = 430 (0x1ae), region = 131  ;;  %s1955_s27 = smov (!%p1428_p4), 0  }
 0x1a2   : > { %s1959_s10 = smov (!%p1428_p4), 0  }
 0x1a6 LB: >> { %v1083_v44 = vld [vmem:[%s1953_s9] sm:$0xf]  ;;  %s1085_s11 = sadd.s32 1, %s1957_s27  ;;  %s1077_s10 = sadd.s32 1, %s1961_s10   ;;  %s1961_s10 = sphi %s1959_s10, %s1077_s10   ;;  %s1957_s27 = sphi %s1955_s27, %s1956_s27   ;;  %s1953_s9 = sphi %s1951_s9, %s1090_s9   ;;  %s1949_s8 = sphi %s1947_s8, %s1091_s8  }
 0x1a7   : >> { %1084 = vst [vmem:[%s1949_s8] sm:$0xf] %v1083_v44  ;;  %p1086_p5 = scmp.ge.s32.totalorder %s1085_s11, %s1842_s7  ;;  %p1076_p6 = scmp.ge.s32.totalorder %s1077_s10, %s1842_s7 }
 0x1a9   : >> { %s2519_s11 = smov (%p1086_p5, %s1085_s11), 0  ;;  %1079 = sbr.rel (!%p1076_p6) target bundleno = 422 (0x1a6), region = 137 }
 0x1aa   : >> { %s1429_s29 = sshll.u32 %s2519_s11, 2  ;;  %s1956_s27 = smov %s2519_s11  }
 0x1ab   : >> { %s1090_s9 = scalar_lea.vmem %s1071_s4, %s1429_s29 [#allocation2]   ;;  %s1091_s8 = scalar_lea.vmem %s1073_s6, %s1429_s29  }
 0x1ae PF: > { %s13_s18 = sadd.s32 1, %s1929_s18   ;;  %s2502_s12 = smov %s1909_s13 }
 0x1af   : > { %p10_p7 = scmp.ge.s32.totalorder %s13_s18, 10   ;;  %s2503_s13 = smov %s2036_s25 }
 0x1b0   : > { %s2504_s14 = smov %s1921_s16  ;;  %s2505_s15 = smov %s1925_s17 }
 0x1b1   : > { %s2506_s16 = smov %s2509_s19  ;;  %s2507_s17 = smov %s2513_s20 }
 0x1b2   :  { %12 = sbr.rel (!%p10_p7) target bundleno = 4 (0x4), region = 148 }

// kernel: lenet_forward.4
= control target key start
LH: loop header
LB: loop body
LE: loop exit
PB: predicated region body
PF: predicated region fallthrough
CT: control target
= control target key end

     0   :  { %s1326_s12 = smov 0   ;;  %s1328_s13 = smov 0   ;;  %s1575_s0 = inlined_call_operand.vmem [shape: bf16[4,50,400], index: 0, kind: input, shape index: {}]   ;;  %s1576_s1 = inlined_call_operand.vmem [shape: bf16[400,128], index: 1, kind: input, shape index: {}]   ;;  %s1577_s2 = inlined_call_operand.vmem [shape: f32[1,128], index: 2, kind: input, shape index: {}]   ;;  %s1578_s3 = inlined_call_operand.vmem [shape: bf16[50,128], index: 3, kind: output, shape index: {}]  }
   0x1   :  { %s1330_s14 = smov 0   ;;  %s1332_s15 = smov 0  }
   0x2   :  { %s1334_s16 = smov 0   ;;  %s1336_s17 = smov 0  }
   0x3   :  { %s1338_s18 = smov 0  }
   0x4 LB: > { %s22_s19 = sadd.s32 1, %s1263_s16  ;;  %s25_s20 = sadd.s32 1, %s1267_s17  ;;  %s1271_s18 = sphi %s1338_s18, %s13_s18   ;;  %s1267_s17 = sphi %s1336_s17, %s1588_s17   ;;  %s1263_s16 = sphi %s1334_s16, %s1587_s16   ;;  %s1259_s15 = sphi %s1332_s15, %s1586_s15   ;;  %s1255_s14 = sphi %s1330_s14, %s1585_s14   ;;  %s1251_s13 = sphi %s1328_s13, %s1584_s13   ;;  %s1247_s12 = sphi %s1326_s12, %s1583_s12  }
   0x5   : > { %p23_p0 = scmp.ge.s32.totalorder %s22_s19, 4  ;;  %s891_s21 = sadd.s32 4294967295, %s1271_s18  }
   0x6   : > { %p112_p1 = scmp.ne.s32.totalorder %s1251_s13, %s1247_s12  ;;  %p113_p2 = scmp.eq.s32.totalorder %s891_s21, 7 }
   0x7   : > { %s1590_s19 = smov (%p23_p0, %s22_s19), 0  ;;  %s1592_s20 = smov (!%p23_p0, %s25_s20), %s1267_s17 }
   0x8   : > { %p895_p3 = scmp.ge.s32.totalorder %s1271_s18, 1  ;;  %p27_p4 = scmp.ge.s32.totalorder %s1592_s20, 2 }
   0x9   : > { %p167_p5 = scmp.lt.s32.totalorder %s1271_s18, 9  ;;  %p1371_p6 = por %p113_p2, %p112_p1 }
   0xa   : > { %s1594_s20 = smov (%p27_p4, %s1592_s20), 0  ;;  %s102_s24 = sadd.s32 1, %s1251_s13 }
   0xb   : > { %p168_p7 = pnand %p895_p3, %p167_p5  ;;  %s99_s23 = ssub.s32 %s1267_s17, %s1594_s20 }
   0xc   : > { %p100_p8 = scmp.eq.s32.totalorder %s99_s23, 0  ;;  %s197_s26 = sand.u32 (!%p168_p7), 1, %s1247_s12  }
   0xd   : > { %171 = sbr.rel (%p168_p7) target bundleno = 332 (0x14c), region = 32  ;;  %s1385_s27 = sshll.u32 (!%p168_p7), %s197_s26, 4 }
   0xe   : > { %s1381_s25 = scalar_select %p100_p8, %s1251_s13, %s102_s24  }
   0xf   : > { %s1397_s7 = sshll.u32 (!%p168_p7), %s1259_s15, 2  ;;  %p206_p9 = scmp.lt.s32.totalorder (!%p168_p7), %s1255_s14, 3 }
  0x10   : > { %p208_p10 = scmp.lt.s32.totalorder (!%p168_p7), %s1397_s7, 6  ;;  %p936_p11 = scmp.ne.s32.totalorder (!%p168_p7), %s1255_s14, 0 }
  0x12   : > { %v1305_v0 = vmov 0   ;;  %v1148_v1 = vld [vmem:[%s1576_s1 + $0x78] sm:$0xff]   ;;  %v1151_v4 = vld [vmem:[%s1576_s1 + $0x70] sm:$0xff]   ;;  %v1154_v7 = vld [vmem:[%s1576_s1 + $0x68] sm:$0xff]   ;;  %s207_s29 = scalar_select %p206_p9, %s1255_s14, 3  ;;  %vm480_vm0 = vcmask 130048  }
  0x13   : > { %536 = vmatprep.subr.bf16.mxu1 %v1305_v0  ;;  %v1149_v2 = vld [vmem:[%s1576_s1 + $0xb8] sm:$0xff]   ;;  %998 = vmatprep.subr.bf16.mxu0 %v1148_v1  ;;  %v1152_v5 = vld [vmem:[%s1576_s1 + $0xb0] sm:$0xff]   ;;  %v1155_v8 = vld [vmem:[%s1576_s1 + $0xa8] sm:$0xff]   ;;  %s209_s5 = scalar_select %p208_p10, %s1397_s7, 6 }
  0x14   : > { %v1150_v3 = vld [vmem:[%s1576_s1 + $0x38] sm:$0xff]   ;;  %537 = vmatpush1.bf16.msra.mxu1 %v1149_v2  ;;  %v1153_v6 = vld [vmem:[%s1576_s1 + $0x30] sm:$0xff]   ;;  %v1156_v9 = vld [vmem:[%s1576_s1 + $0x28] sm:$0xff]   ;;  %s1026_s11 = smul.u32 28, %s207_s29 }
  0x15   : > { %999 = vmatpush3.bf16.msra.mxu0 %v1150_v3  ;;  %538 = vmatprep.subr.bf16.mxu1 %v1305_v0  ;;  %v1157_v10 = vld [vmem:[%s1576_s1 + $0x60] sm:$0xff]   ;;  %s898_s23 = sshll.u32 %s209_s5, 2  ;;  %v1160_v13 = vld [vmem:[%s1576_s1 + $0x58] sm:$0xff]   ;;  %v1163_v16 = vld [vmem:[%s1576_s1 + $0x50] sm:$0xff]  }
  0x16   : > { %1000 = vmatprep.subr.bf16.mxu0 %v1151_v4  ;;  %v1158_v11 = vld [vmem:[%s1576_s1 + $0xa0] sm:$0xff]   ;;  %v1161_v14 = vld [vmem:[%s1576_s1 + $0x98] sm:$0xff]   ;;  %s212_s4 = sadd.s32 %s1026_s11, %s898_s23  ;;  %v1164_v17 = vld [vmem:[%s1576_s1 + $0x90] sm:$0xff]  }
  0x17   : > { %v1159_v12 = vld [vmem:[%s1576_s1 + $0x20] sm:$0xff]   ;;  %v1162_v15 = vld [vmem:[%s1576_s1 + $0x18] sm:$0xff]   ;;  %s899_s9 = sshll.u32 %s212_s4, 2  ;;  %v1165_v18 = vld [vmem:[%s1576_s1 + $0x10] sm:$0xff]  }
  0x18   : > { %539 = vmatpush1.bf16.msra.mxu1 %v1152_v5  ;;  %v1166_v19 = vld [vmem:[%s1576_s1 + $0x48] sm:$0xff]   ;;  %s1459_s30 = scalar_lea.vmem %s1575_s0, %s899_s9  ;;  %v1169_v23 = vld [vmem:[%s1576_s1 + $0x40] sm:$0xff]  }
  0x19   : > { %1001 = vmatpush3.bf16.msra.mxu0 %v1153_v6  ;;  %540 = vmatprep.subr.bf16.mxu1 %v1305_v0  ;;  %v1167_v20 = vld [vmem:[%s1576_s1 + $0x88] sm:$0xff]   ;;  %v1174_v22 = vld [vmem:[%s1459_s30 + $0x4] ss:$16 sps:$4 sm:$0xff]   ;;  %v1172_v27 = vld [vmem:[%s1459_s30] ss:$16 sps:$4 sm:$0xff]  }
  0x1a   : > { %1002 = vmatprep.subr.bf16.mxu0 %v1154_v7  ;;  %v1168_v21 = vld [vmem:[%s1576_s1 + $0x8] sm:$0xff]   ;;  %519 = vmatprep.mubr.bf16.mxu0 %v1174_v22  ;;  %v1170_v25 = vld [vmem:[%s1576_s1 + $0x80] sm:$0xff]  }
  0x1b   : > { %v1178_v24 = vld [vmem:[%s1459_s30 + $0xc] ss:$16 sps:$4 sm:$0xff]   ;;  %v1171_v26 = vld [vmem:[%s1576_s1] sm:$0xff]   ;;  %v1176_v30 = vld [vmem:[%s1459_s30 + $0x8] ss:$16 sps:$4 sm:$0xff]  }
  0x1c   : > { %541 = vmatpush1.bf16.msra.mxu1 %v1155_v8  ;;  %934 = vmatprep.mubr.msk.bf16.mxu1 %vm480_vm0, %v1178_v24  ;;  %v1175_v28 = vld [vmem:[%s1576_s1 + $0xc0] sm:$0xff]   ;;  %v1182_v31 = vld [vmem:[%s1459_s30 + $0x2c] ss:$16 sps:$4 sm:$0xff]   ;;  %v1184_v33 = vld [vmem:[%s1459_s30 + $0x28] ss:$16 sps:$4 sm:$0xff]  }
  0x1d   : > { %1003 = vmatpush3.bf16.msra.mxu0 %v1156_v9  ;;  %542 = vmatprep.subr.bf16.mxu1 %v1305_v0  ;;  %v1179_v29 = vld [vmem:[%s1459_s30 + $0x24] ss:$16 sps:$4 sm:$0xff]   ;;  %v1181_v32 = vld [vmem:[%s1459_s30 + $0x20] ss:$16 sps:$4 sm:$0xff]   ;;  %s1496_s30 = scalar_lea.vmem [#allocation2], %s1385_s27  }
  0x1e   : > { %1004 = vmatprep.subr.bf16.mxu0 %v1157_v10  ;;  %v900_v36 = vld [vmem:[%s1577_s2] ss:$0 sm:$0xff] }
  0x20   : > { %543 = vmatpush1.bf16.msra.mxu1 %v1158_v11 }
  0x21   : > { %1005 = vmatpush3.bf16.msra.mxu0 %v1159_v12  ;;  %544 = vmatprep.subr.bf16.mxu1 %v1305_v0 }
  0x22   : > { %1006 = vmatprep.subr.bf16.mxu0 %v1160_v13 }
  0x24   : > { %545 = vmatpush1.bf16.msra.mxu1 %v1161_v14 }
  0x25   : > { %1007 = vmatpush3.bf16.msra.mxu0 %v1162_v15  ;;  %546 = vmatprep.subr.bf16.mxu1 %v1305_v0 }
  0x26   : > { %1008 = vmatprep.subr.bf16.mxu0 %v1163_v16 }
  0x28   : > { %547 = vmatpush1.bf16.msra.mxu1 %v1164_v17 }
  0x29   : > { %1009 = vmatpush3.bf16.msra.mxu0 %v1165_v18  ;;  %548 = vmatprep.subr.bf16.mxu1 %v1305_v0 }
  0x2a   : > { %1010 = vmatprep.subr.bf16.mxu0 %v1166_v19 }
  0x2c   : > { %549 = vmatpush1.bf16.msra.mxu1 %v1167_v20 }
  0x2d   : > { %1011 = vmatpush3.bf16.msra.mxu0 %v1168_v21  ;;  %550 = vmatprep.subr.bf16.mxu1 %v1305_v0 }
  0x2e   : > { %1012 = vmatprep.subr.bf16.mxu0 %v1169_v23 }
  0x30   : > { %551 = vmatpush1.bf16.msra.mxu1 %v1170_v25 }
  0x31   : > { %1013 = vmatpush3.bf16.msra.mxu0 %v1171_v26  ;;  %566 = vmatprep.subr.bf16.mxu1 %v1305_v0 }
  0x34   : > { %520 = vmatmul.mubr.bf16.vlgmr.msra.gmra.mxu0 %v1172_v27  ;;  %567 = vmatpush2.bf16.msra.mxu1 %v1175_v28 }
  0x35   : > { %527 = vmatprep.mubr.bf16.mxu0 %v1179_v29 }
  0x37   : > { %569 = vmatmul.mubr.bf16.vlgmr.msra.gmra.mxu1 %v1176_v30 }
  0x38   : > { %935 = vmatprep.mubr.msk.bf16.mxu1 %vm480_vm0, %v1182_v31 }
  0x3c   : > { %528 = vmatmul.mubr.bf16.gmra.mxu0 %v1181_v32 }
  0x3f   : > { %577 = vmatmul.mubr.bf16.gmra.mxu1 %v1184_v33 }
  0xf4   : > { %v1014_v34 = vpop.f32.mrf.mxu0 }
  0xf6   : > { %v1015_v35 = vpop.f32.mrf.mxu0 }
  0xf7   : > { %v1016_v37 = vadd.f32 %v1015_v35, %v1014_v34  ;;  %v570_v38 = vpop.f32.mrf.mxu1 }
  0xf8   : > { %v1017_v39 = vpop.f32.mrf.mxu0 }
  0xf9   : > { %v522_v40 = vadd.f32 %v1016_v37, %v900_v36  ;;  %v572_v41 = vpop.f32.mrf.mxu1 }
  0xfa   : > { %v1018_v42 = vpop.f32.mrf.mxu0 }
  0xfb   : > { %v571_v43 = vadd.f32 %v570_v38, %v522_v40  ;;  %v1019_v44 = vadd.f32 %v1018_v42, %v1017_v39  ;;  %v573_v45 = vpop.f32.mrf.mxu1 }
  0xfc   : > { %v1020_v46 = vpop.f32.mrf.mxu0 }
  0xfd   : > { %v585_v47 = vmax.f32 %v571_v43, 0.0  ;;  %v525_v48 = vadd.f32 %v1019_v44, %v900_v36  ;;  %v575_v49 = vpop.f32.mrf.mxu1 }
  0xfe   : > { %v1021_v50 = vpop.f32.mrf.mxu0 }
  0xff   : > { %v574_v51 = vadd.f32 %v573_v45, %v525_v48  ;;  %v1022_v52 = vadd.f32 %v1021_v50, %v1020_v46  ;;  %v578_v53 = vpop.f32.mrf.mxu1 }
 0x100   : > { %v1023_v54 = vpop.f32.mrf.mxu0 }
 0x101   : > { %v586_v55 = vmax.f32 %v574_v51, 0.0  ;;  %v530_v56 = vadd.f32 %v1022_v52, %v900_v36  ;;  %v580_v57 = vpop.f32.mrf.mxu1 }
 0x102   : > { %v1024_v58 = vpop.f32.mrf.mxu0 }
 0x103   : > { %v579_v59 = vadd.f32 %v578_v53, %v530_v56  ;;  %v1025_v60 = vadd.f32 %v1024_v58, %v1023_v54  ;;  %v581_v61 = vpop.f32.mrf.mxu1 }
 0x105   : > { %v587_v62 = vmax.f32 %v579_v59, 0.0  ;;  %v533_v63 = vadd.f32 %v1025_v60, %v900_v36  ;;  %v583_v0 = vpop.f32.mrf.mxu1  ;;  %594 = sbr.rel (%p936_p11) target bundleno = 270 (0x10e), region = 36 }
 0x107   : > { %v582_v1 = vadd.f32 %v581_v61, %v533_v63 }
 0x109   : > { %v588_v2 = vmax.f32 %v582_v1, 0.0 }
 0x10a   : > { %v977_v3 = vpack.c.bf16 %v586_v55, %v585_v47 }
 0x10b   : > { %v982_v4 = vpack.c.bf16 %v588_v2, %v587_v62 }
 0x10c   : > { %978 = vst [vmem:[%s1496_s30] sm:$0xff] %v977_v3  }
 0x10d   : > { %994 = vst [vmem:[%s1496_s30 + $0x8] sm:$0xff] %v982_v4  }
 0x10e PF: > { %p941_p12 = scmp.le.s32.totalorder %s1255_s14, 0 }
 0x110   : > { %616 = sbr.rel (%p941_p12) target bundleno = 284 (0x11c), region = 40 }
 0x115   : > { %v617_v5 = vld [vmem:[%s1496_s30] sm:$0xf]  ;;  %v618_v6 = vld [vmem:[%s1496_s30 + $0x4] sm:$0xf]  ;;  %v967_v7 = vpack.c.bf16 %v585_v47, %v585_v47  ;;  %v968_v8 = vpack.c.bf16 %v586_v55, %v586_v55  ;;  %v619_v9 = vld [vmem:[%s1496_s30 + $0x8] sm:$0xf]  ;;  %v969_v10 = vpack.c.bf16 %v587_v62, %v587_v62  ;;  %v970_v11 = vpack.c.bf16 %v588_v2, %v588_v2 }
 0x116   : > { %v620_v12 = vld [vmem:[%s1496_s30 + $0xc] sm:$0xf] }
 0x117   : > { %v635_v13 = vmax.bf16 %v967_v7, %v617_v5  ;;  %v636_v14 = vmax.bf16 %v968_v8, %v618_v6  ;;  %v637_v15 = vmax.bf16 %v969_v10, %v619_v9  ;;  %v638_v16 = vmax.bf16 %v970_v11, %v620_v12 }
 0x119   : > { %v995_v17 = vcombine.low %v635_v13, %v636_v14  ;;  %v996_v18 = vcombine.low %v637_v15, %v638_v16 }
 0x11b   : > { %988 = vst [vmem:[%s1496_s30] sm:$0xff] %v995_v17   ;;  %997 = vst [vmem:[%s1496_s30 + $0x8] sm:$0xff] %v996_v18  }
 0x11c PF: > { %649 = sbr.rel (!%p1371_p6) target bundleno = 332 (0x14c), region = 44  ;;  %s651_s14 = ssub.s32 (%p1371_p6), 7, %s1397_s7 }
 0x11d   : > { %s971_s27 = sshll.u32 (%p1371_p6), %s1259_s15, 4  ;;  %p652_p13 = scmp.lt.s32.totalorder (%p1371_p6), %s651_s14, 4 }
 0x11e   : > { %s1515_s6 = scalar_lea.vmem (%p1371_p6), %s1578_s3, %s971_s27  }
 0x121   : > { %s1596_s14 = smov (!%p652_p13, %s651_s14), 4 }
 0x122   : > { %s948_s5 = sshll.u32 %s1596_s14, 6 }
 0x123   : > { %p951_p0 = scmp.eq.s32.totalorder %s948_s5, 0 }
 0x124   : > { %s1521_s8 = sshrl.u32 (!%p951_p0), %s1596_s14, 2 }
 0x125   : > { %660 = sbr.rel (%p951_p0) target bundleno = 332 (0x14c), region = 48  ;;  %p952_p1 = scmp.le.s32.totalorder (!%p951_p0), %s1521_s8, 0 }
 0x12a   : > { %836 = sbr.rel (%p952_p1) target bundleno = 315 (0x13b), region = 120  ;;  %s1580_s15 = smov (!%p952_p1), %s1515_s6 }
 0x12b   : > { %s1581_s22 = smov (!%p952_p1), %s1496_s30  ;;  %s1530_s7 = smov (!%p952_p1), 0  }
 0x12c   : > { %s1285_s9 = smov (!%p952_p1), 0  }
 0x12f LB: >> { %v677_v19 = vld [vmem:[%s1279_s22] sm:$0xf]  ;;  %v679_v20 = vld [vmem:[%s1279_s22 + $0x4] sm:$0xf]  ;;  %v681_v21 = vld [vmem:[%s1279_s22 + $0x8] sm:$0xf]  ;;  %s1287_s9 = sphi %s1285_s9, %s671_s9   ;;  %s1283_s7 = sphi %s1530_s7, %s1582_s7   ;;  %s1279_s22 = sphi %s1581_s22, %s690_s22   ;;  %s1275_s15 = sphi %s1580_s15, %s691_s15  }
 0x130   : >> { %678 = vst [vmem:[%s1275_s15] sm:$0xf] %v677_v19  ;;  %680 = vst [vmem:[%s1275_s15 + $0x4] sm:$0xf] %v679_v20  ;;  %v683_v22 = vld [vmem:[%s1279_s22 + $0xc] sm:$0xf]  ;;  %s685_s10 = sadd.s32 1, %s1283_s7 }
 0x131   : >> { %682 = vst [vmem:[%s1275_s15 + $0x8] sm:$0xf] %v681_v21  ;;  %684 = vst [vmem:[%s1275_s15 + $0xc] sm:$0xf] %v683_v22  ;;  %p686_p2 = scmp.ge.s32.totalorder %s685_s10, %s1521_s8  ;;  %s671_s9 = sadd.s32 1, %s1287_s9  }
 0x132   : >> { %p670_p3 = scmp.ge.s32.totalorder %s671_s9, %s1521_s8 }
 0x133   : >> { %s1598_s10 = smov (%p686_p2, %s685_s10), 0 }
 0x134   : >> { %s953_s12 = sshll.u32 %s1598_s10, 4  ;;  %s1582_s7 = smov %s1598_s10 }
 0x135   : >> { %s690_s22 = scalar_lea.vmem %s1496_s30, %s953_s12 [#allocation2]   ;;  %s691_s15 = scalar_lea.vmem %s1515_s6, %s953_s12  }
 0x136   : > { %673 = sbr.rel (!%p670_p3) target bundleno = 303 (0x12f), region = 126 }
 0x13b PF: > { %s1546_s11 = sand.u32 3, %s1596_s14   ;;  %s972_s21 = sshll.u32 %s1521_s8, 4 }
 0x13c   : > { %s696_s23 = scalar_lea.vmem %s1496_s30, %s972_s21 [#allocation2]   ;;  %s698_s24 = scalar_lea.vmem %s1515_s6, %s972_s21  }
 0x13d   : > { %p958_p4 = scmp.le.s32.totalorder %s1546_s11, 0 }
 0x13e   : > { %s1289_s26 = smov (!%p958_p4), %s698_s24   ;;  %s1293_s28 = smov (!%p958_p4), %s696_s23  }
 0x13f   : > { %850 = sbr.rel (%p958_p4) target bundleno = 332 (0x14c), region = 131  ;;  %s1297_s27 = smov (!%p958_p4), 0  }
 0x140   : > { %s1301_s4 = smov (!%p958_p4), 0  }
 0x144 LB: >> { %v708_v23 = vld [vmem:[%s1295_s28] sm:$0xf]  ;;  %s710_s14 = sadd.s32 1, %s1299_s27  ;;  %s702_s4 = sadd.s32 1, %s1303_s4   ;;  %s1303_s4 = sphi %s1301_s4, %s702_s4   ;;  %s1299_s27 = sphi %s1297_s27, %s1298_s27   ;;  %s1295_s28 = sphi %s1293_s28, %s715_s28   ;;  %s1291_s26 = sphi %s1289_s26, %s716_s26  }
 0x145   : >> { %709 = vst [vmem:[%s1291_s26] sm:$0xf] %v708_v23  ;;  %p711_p5 = scmp.ge.s32.totalorder %s710_s14, %s1546_s11  ;;  %p701_p6 = scmp.ge.s32.totalorder %s702_s4, %s1546_s11 }
 0x147   : >> { %s1600_s14 = smov (%p711_p5, %s710_s14), 0  ;;  %704 = sbr.rel (!%p701_p6) target bundleno = 324 (0x144), region = 137 }
 0x148   : >> { %s959_s30 = sshll.u32 %s1600_s14, 2  ;;  %s1298_s27 = smov %s1600_s14  }
 0x149   : >> { %s715_s28 = scalar_lea.vmem %s696_s23, %s959_s30 [#allocation2]   ;;  %s716_s26 = scalar_lea.vmem %s698_s24, %s959_s30  }
 0x14c PF: > { %s13_s18 = sadd.s32 1, %s1271_s18   ;;  %s1583_s12 = smov %s1251_s13 }
 0x14d   : > { %p10_p7 = scmp.ge.s32.totalorder %s13_s18, 10   ;;  %s1584_s13 = smov %s1381_s25 }
 0x14e   : > { %s1585_s14 = smov %s1263_s16  ;;  %s1586_s15 = smov %s1267_s17 }
 0x14f   : > { %s1587_s16 = smov %s1590_s19  ;;  %s1588_s17 = smov %s1594_s20 }
 0x150   :  { %12 = sbr.rel (!%p10_p7) target bundleno = 4 (0x4), region = 148 }

// kernel: lenet_forward.5
= control target key start
LH: loop header
LB: loop body
LE: loop exit
PB: predicated region body
PF: predicated region fallthrough
CT: control target
= control target key end

     0   :  { %v1144_v41 = vmov 0.0   ;;  %vm1145_vm0 = vmmov 0   ;;  %vm462_vm1 = vcmask 261120   ;;  %s1432_s1 = inlined_call_operand.vmem [shape: bf16[800,128], index: 1, kind: input, shape index: {}]   ;;  %s1433_s0 = inlined_call_operand.vmem [shape: bf16[8,800], index: 0, kind: input, shape index: {}]   ;;  %s1434_s3 = inlined_call_operand.vmem [shape: bf16[128,128], index: 3, kind: input, shape index: {}]   ;;  %s1435_s5 = inlined_call_operand.vmem [shape: bf16[128,128], index: 5, kind: input, shape index: {}]   ;;  %s1436_s2 = inlined_call_operand.vmem [shape: f32[1,128], index: 2, kind: input, shape index: {}]   ;;  %s1437_s4 = inlined_call_operand.vmem [shape: f32[1,128], index: 4, kind: input, shape index: {}]   ;;  %s1438_s6 = inlined_call_operand.vmem [shape: f32[1,128], index: 6, kind: input, shape index: {}]   ;;  %s1439_s7 = inlined_call_operand.vmem [shape: f32[8,128], index: 7, kind: output, shape index: {}]  }
   0x1   :  { %v1071_v0 = vld [vmem:[%s1432_s1 + $0x78] sm:$0xff]   ;;  %v1075_v4 = vld [vmem:[%s1432_s1 + $0x70] sm:$0xff]   ;;  %v1079_v8 = vld [vmem:[%s1432_s1 + $0x68] sm:$0xff]  }
   0x2   :  { %v1072_v1 = vld [vmem:[%s1432_s1 + $0x38] sm:$0xff]   ;;  %934 = vmatprep.subr.bf16.mxu0 %v1071_v0  ;;  %v1076_v5 = vld [vmem:[%s1432_s1 + $0x30] sm:$0xff]   ;;  %v1080_v9 = vld [vmem:[%s1432_s1 + $0x28] sm:$0xff]  }
   0x3   :  { %v1073_v2 = vld [vmem:[%s1432_s1 + $0xf8] sm:$0xff]   ;;  %935 = vmatpush3.bf16.msra.mxu0 %v1072_v1  ;;  %v1077_v6 = vld [vmem:[%s1432_s1 + $0xf0] sm:$0xff]   ;;  %v1081_v10 = vld [vmem:[%s1432_s1 + $0xe8] sm:$0xff]  }
   0x4   :  { %v1074_v3 = vld [vmem:[%s1432_s1 + $0xb8] sm:$0xff]   ;;  %956 = vmatprep.subr.bf16.mxu1 %v1073_v2  ;;  %936 = vmatprep.subr.bf16.mxu0 %v1075_v4  ;;  %v1078_v7 = vld [vmem:[%s1432_s1 + $0xb0] sm:$0xff]   ;;  %v1082_v11 = vld [vmem:[%s1432_s1 + $0xa8] sm:$0xff]  }
   0x5   :  { %957 = vmatpush3.bf16.msra.mxu1 %v1074_v3  ;;  %v1083_v12 = vld [vmem:[%s1432_s1 + $0x60] sm:$0xff]   ;;  %v1087_v16 = vld [vmem:[%s1432_s1 + $0x58] sm:$0xff]   ;;  %v1091_v20 = vld [vmem:[%s1432_s1 + $0x50] sm:$0xff]  }
   0x6   :  { %958 = vmatprep.subr.bf16.mxu1 %v1077_v6  ;;  %v1084_v13 = vld [vmem:[%s1432_s1 + $0x20] sm:$0xff]   ;;  %v1088_v17 = vld [vmem:[%s1432_s1 + $0x18] sm:$0xff]   ;;  %v1092_v21 = vld [vmem:[%s1432_s1 + $0x10] sm:$0xff]  }
   0x7   :  { %937 = vmatpush3.bf16.msra.mxu0 %v1076_v5  ;;  %v1085_v14 = vld [vmem:[%s1432_s1 + $0xe0] sm:$0xff]   ;;  %v1089_v18 = vld [vmem:[%s1432_s1 + $0xd8] sm:$0xff]   ;;  %v1093_v22 = vld [vmem:[%s1432_s1 + $0xd0] sm:$0xff]  }
   0x8   :  { %938 = vmatprep.subr.bf16.mxu0 %v1079_v8  ;;  %v1086_v15 = vld [vmem:[%s1432_s1 + $0xa0] sm:$0xff]   ;;  %v1090_v19 = vld [vmem:[%s1432_s1 + $0x98] sm:$0xff]   ;;  %v1094_v23 = vld [vmem:[%s1432_s1 + $0x90] sm:$0xff]  }
   0x9   :  { %959 = vmatpush3.bf16.msra.mxu1 %v1078_v7  ;;  %v1095_v24 = vld [vmem:[%s1432_s1 + $0x48] sm:$0xff]   ;;  %v1099_v28 = vld [vmem:[%s1432_s1 + $0x40] sm:$0xff]   ;;  %v1106_v35 = vld [vmem:[%s1432_s1 + $0x178] sm:$0xff]  }
   0xa   :  { %960 = vmatprep.subr.bf16.mxu1 %v1081_v10  ;;  %v1096_v25 = vld [vmem:[%s1432_s1 + $0x8] sm:$0xff]   ;;  %v1100_v29 = vld [vmem:[%s1432_s1] sm:$0xff]   ;;  %v1109_v39 = vld [vmem:[%s1432_s1 + $0x138] sm:$0xff]  }
   0xb   :  { %939 = vmatpush3.bf16.msra.mxu0 %v1080_v9  ;;  %v1097_v26 = vld [vmem:[%s1432_s1 + $0xc8] sm:$0xff]   ;;  %v1101_v30 = vld [vmem:[%s1432_s1 + $0xc0] sm:$0xff]   ;;  %v1110_v40 = vld [vmem:[%s1432_s1 + $0x170] sm:$0xff]  }
   0xc   :  { %940 = vmatprep.subr.bf16.mxu0 %v1083_v12  ;;  %v1098_v27 = vld [vmem:[%s1432_s1 + $0x88] sm:$0xff]   ;;  %v27_v31 = vld [vmem:[%s1433_s0] sm:$0xff]  ;;  %v1111_v42 = vld [vmem:[%s1432_s1 + $0x130] sm:$0xff]  }
   0xd   :  { %961 = vmatpush3.bf16.msra.mxu1 %v1082_v11  ;;  %v858_v32 = vcombine.low %v27_v31, %v27_v31  ;;  %v859_v33 = vcombine.high %v27_v31, %v27_v31  ;;  %v1105_v34 = vld [vmem:[%s1432_s1 + $0x80] sm:$0xff]   ;;  %v28_v36 = vld [vmem:[%s1433_s0 + $0x8] sm:$0xff]  ;;  %v1116_v47 = vld [vmem:[%s1432_s1 + $0x158] sm:$0xff]  }
   0xe   :  { %962 = vmatprep.subr.bf16.mxu1 %v1085_v14  ;;  %v860_v37 = vcombine.low %v28_v36, %v28_v36  ;;  %v861_v38 = vcombine.high %v28_v36, %v28_v36  ;;  %v1112_v43 = vld [vmem:[%s1432_s1 + $0x168] sm:$0xff]   ;;  %v1114_v45 = vld [vmem:[%s1432_s1 + $0x160] sm:$0xff]   ;;  %v1117_v49 = vld [vmem:[%s1432_s1 + $0x118] sm:$0xff]  }
   0xf   :  { %941 = vmatpush3.bf16.msra.mxu0 %v1084_v13  ;;  %498 = vmatprep.mubr.bf16.mxu0 %v859_v33  ;;  %v1113_v44 = vld [vmem:[%s1432_s1 + $0x128] sm:$0xff]   ;;  %v1115_v46 = vld [vmem:[%s1432_s1 + $0x120] sm:$0xff]   ;;  %v1118_v50 = vld [vmem:[%s1432_s1 + $0x150] sm:$0xff]  }
  0x10   :  { %942 = vmatprep.subr.bf16.mxu0 %v1087_v16  ;;  %538 = vmatprep.mubr.bf16.mxu1 %v861_v38  ;;  %v1122_v48 = vld [vmem:[%s1432_s1 + $0x188] sm:$0xff]   ;;  %v1125_v51 = vld [vmem:[%s1432_s1 + $0x180] sm:$0xff]   ;;  %v29_v52 = vld [vmem:[%s1433_s0 + $0x10] sm:$0xff] }
  0x11   :  { %963 = vmatpush3.bf16.msra.mxu1 %v1086_v15  ;;  %v863_v53 = vcombine.high %v29_v52, %v29_v52  ;;  %v1104_v54 = vld [vmem:[%s1433_s0 + $0x18] ss:$0 sps:$4 sm:$0xff]   ;;  %v1119_v55 = vld [vmem:[%s1432_s1 + $0x110] sm:$0xff]   ;;  %v1120_v56 = vld [vmem:[%s1432_s1 + $0x148] sm:$0xff]   ;;  %v862_v60 = vcombine.low %v29_v52, %v29_v52 }
  0x12   :  { %964 = vmatprep.subr.bf16.mxu1 %v1089_v18  ;;  %v1121_v57 = vld [vmem:[%s1432_s1 + $0x108] sm:$0xff]   ;;  %v1123_v58 = vld [vmem:[%s1432_s1 + $0x140] sm:$0xff]   ;;  %v1128_v61 = vld [vmem:[%s1434_s3 + $0x38] sm:$0xff]  }
  0x13   :  { %943 = vmatpush3.bf16.msra.mxu0 %v1088_v17  ;;  %v1124_v59 = vld [vmem:[%s1432_s1 + $0x100] sm:$0xff]   ;;  %v1129_v62 = vld [vmem:[%s1434_s3 + $0x30] sm:$0xff]   ;;  %v1130_v63 = vld [vmem:[%s1434_s3 + $0x28] sm:$0xff]  }
  0x14   :  { %944 = vmatprep.subr.bf16.mxu0 %v1091_v20  ;;  %v1131_v0 = vld [vmem:[%s1434_s3 + $0x20] sm:$0xff]   ;;  %v1132_v1 = vld [vmem:[%s1434_s3 + $0x18] sm:$0xff]   ;;  %v1133_v2 = vld [vmem:[%s1434_s3 + $0x10] sm:$0xff]  }
  0x15   :  { %965 = vmatpush3.bf16.msra.mxu1 %v1090_v19  ;;  %v1134_v3 = vld [vmem:[%s1434_s3 + $0x8] sm:$0xff]   ;;  %v1135_v4 = vld [vmem:[%s1434_s3] sm:$0xff]   ;;  %v1136_v5 = vld [vmem:[%s1435_s5 + $0x38] sm:$0xff]  }
  0x16   :  { %966 = vmatprep.subr.bf16.mxu1 %v1093_v22  ;;  %v1137_v6 = vld [vmem:[%s1435_s5 + $0x30] sm:$0xff]   ;;  %v1138_v7 = vld [vmem:[%s1435_s5 + $0x28] sm:$0xff]   ;;  %v1139_v8 = vld [vmem:[%s1435_s5 + $0x20] sm:$0xff]  }
  0x17   :  { %945 = vmatpush3.bf16.msra.mxu0 %v1092_v21  ;;  %v1140_v9 = vld [vmem:[%s1435_s5 + $0x18] sm:$0xff]   ;;  %v1141_v10 = vld [vmem:[%s1435_s5 + $0x10] sm:$0xff]   ;;  %v1143_v38 = vld [vmem:[%s1435_s5] sm:$0xff]  }
  0x18   :  { %946 = vmatprep.subr.bf16.mxu0 %v1095_v24  ;;  %v857_v24 = vld [vmem:[%s1436_s2] ss:$0 sm:$0xff] }
  0x19   :  { %967 = vmatpush3.bf16.msra.mxu1 %v1094_v23 }
  0x1a   :  { %968 = vmatprep.subr.bf16.mxu1 %v1097_v26 }
  0x1b   :  { %947 = vmatpush3.bf16.msra.mxu0 %v1096_v25 }
  0x1c   :  { %948 = vmatprep.subr.bf16.mxu0 %v1099_v28 }
  0x1d   :  { %969 = vmatpush3.bf16.msra.mxu1 %v1098_v27 }
  0x1e   :  { %970 = vmatprep.subr.bf16.mxu1 %v1101_v30 }
  0x1f   :  { %949 = vmatpush3.bf16.msra.mxu0 %v1100_v29 }
  0x20   :  { %978 = vmatprep.subr.bf16.mxu0 %v1106_v35 }
  0x21   :  { %971 = vmatpush3.bf16.msra.mxu1 %v1105_v34 }
  0x22   :  { %499 = vmatmul.mubr.bf16.vlgmr.msra.gmra.mxu0 %v858_v32  ;;  %1021 = vmatprep.subr.bf16.mxu1 %v1144_v41 }
  0x23   :  { %979 = vmatpush3.bf16.msra.mxu0 %v1109_v39  ;;  %578 = vmatprep.mubr.bf16.mxu0 %v863_v53  ;;  %v916_v39 = vld [vmem:[%s1437_s4] ss:$0 sm:$0xff] }
  0x24   :  { %539 = vmatmul.mubr.bf16.vlgmr.msra.gmra.mxu1 %v860_v37  ;;  %980 = vmatprep.subr.bf16.mxu0 %v1110_v40  ;;  %v1142_v37 = vld [vmem:[%s1435_s5 + $0x8] sm:$0xff]  }
  0x25   :  { %1025 = vmatprep.mubr.msk.bf16.mxu1 %vm1145_vm0, %v1144_v41  ;;  %1022 = vmatpush3.bf16.msra.mxu1 %v1122_v48 }
  0x26   :  { %1023 = vmatprep.subr.bf16.mxu1 %v1144_v41 }
  0x27   :  { %981 = vmatpush3.bf16.msra.mxu0 %v1111_v42 }
  0x28   :  { %982 = vmatprep.subr.bf16.mxu0 %v1112_v43 }
  0x29   :  { %1024 = vmatpush3.bf16.msra.mxu1 %v1125_v51 }
  0x2a   :  { %1029 = vmatprep.subr.bf16.mxu1 %v1144_v41 }
  0x2b   :  { %983 = vmatpush3.bf16.msra.mxu0 %v1113_v44 }
  0x2c   :  { %984 = vmatprep.subr.bf16.mxu0 %v1114_v45  ;;  %1026 = vmatmul.mubr.msk.bf16.vlgmr.msra.gmra.mxu1 %vm462_vm1, %v1104_v54 }
  0x2d   :  { %1045 = vmatprep.mubr.msk.bf16.mxu1 %vm1145_vm0, %v1144_v41  ;;  %1030 = vmatpush3.bf16.msra.mxu1 %v1128_v61 }
  0x2e   :  { %1031 = vmatprep.subr.bf16.mxu1 %v1144_v41 }
  0x2f   :  { %985 = vmatpush3.bf16.msra.mxu0 %v1115_v46 }
  0x30   :  { %986 = vmatprep.subr.bf16.mxu0 %v1116_v47 }
  0x31   :  { %1032 = vmatpush3.bf16.msra.mxu1 %v1129_v62 }
  0x32   :  { %1033 = vmatprep.subr.bf16.mxu1 %v1144_v41 }
  0x33   :  { %987 = vmatpush3.bf16.msra.mxu0 %v1117_v49 }
  0x34   :  { %988 = vmatprep.subr.bf16.mxu0 %v1118_v50 }
  0x35   :  { %1034 = vmatpush3.bf16.msra.mxu1 %v1130_v63 }
  0x36   :  { %1035 = vmatprep.subr.bf16.mxu1 %v1144_v41 }
  0x37   :  { %989 = vmatpush3.bf16.msra.mxu0 %v1119_v55 }
  0x38   :  { %990 = vmatprep.subr.bf16.mxu0 %v1120_v56 }
  0x39   :  { %1036 = vmatpush3.bf16.msra.mxu1 %v1131_v0 }
  0x3a   :  { %1037 = vmatprep.subr.bf16.mxu1 %v1144_v41 }
  0x3b   :  { %991 = vmatpush3.bf16.msra.mxu0 %v1121_v57 }
  0x3c   :  { %992 = vmatprep.subr.bf16.mxu0 %v1123_v58 }
  0x3d   :  { %1038 = vmatpush3.bf16.msra.mxu1 %v1132_v1 }
  0x3e   :  { %1039 = vmatprep.subr.bf16.mxu1 %v1144_v41 }
  0x3f   :  { %993 = vmatpush3.bf16.msra.mxu0 %v1124_v59 }
  0x40   :  { %1049 = vmatprep.subr.bf16.mxu0 %v1144_v41 }
  0x41   :  { %1040 = vmatpush3.bf16.msra.mxu1 %v1133_v2 }
  0x42   :  { %579 = vmatmul.mubr.bf16.vlgmr.msra.gmra.mxu0 %v862_v60  ;;  %1041 = vmatprep.subr.bf16.mxu1 %v1144_v41 }
  0x43   :  { %1065 = vmatprep.mubr.msk.bf16.mxu0 %vm1145_vm0, %v1144_v41  ;;  %1050 = vmatpush3.bf16.msra.mxu0 %v1136_v5 }
  0x44   :  { %1051 = vmatprep.subr.bf16.mxu0 %v1144_v41 }
  0x45   :  { %1042 = vmatpush3.bf16.msra.mxu1 %v1134_v3 }
  0x46   :  { %1043 = vmatprep.subr.bf16.mxu1 %v1144_v41 }
  0x47   :  { %1052 = vmatpush3.bf16.msra.mxu0 %v1137_v6 }
  0x48   :  { %1053 = vmatprep.subr.bf16.mxu0 %v1144_v41 }
  0x49   :  { %1044 = vmatpush3.bf16.msra.mxu1 %v1135_v4 }
  0x4b   :  { %1054 = vmatpush3.bf16.msra.mxu0 %v1138_v7 }
  0x4c   :  { %1055 = vmatprep.subr.bf16.mxu0 %v1144_v41 }
  0x4f   :  { %1056 = vmatpush3.bf16.msra.mxu0 %v1139_v8 }
  0x50   :  { %1057 = vmatprep.subr.bf16.mxu0 %v1144_v41 }
  0x53   :  { %1058 = vmatpush3.bf16.msra.mxu0 %v1140_v9 }
  0x54   :  { %1059 = vmatprep.subr.bf16.mxu0 %v1144_v41 }
  0x57   :  { %1060 = vmatpush3.bf16.msra.mxu0 %v1141_v10 }
  0x58   :  { %1061 = vmatprep.subr.bf16.mxu0 %v1144_v41 }
  0x5b   :  { %1062 = vmatpush3.bf16.msra.mxu0 %v1142_v37 }
  0x5c   :  { %1063 = vmatprep.subr.bf16.mxu0 %v1144_v41  ;;  %v925_v41 = vld [vmem:[%s1438_s6] ss:$0 sm:$0xff] }
  0x5f   :  { %1064 = vmatpush3.bf16.msra.mxu0 %v1143_v38 }
  0xe2   :  { %v950_v11 = vpop.f32.mrf.mxu0 }
  0xe4   :  { %v951_v12 = vpop.f32.mrf.mxu0  ;;  %v972_v13 = vpop.f32.mrf.mxu1 }
  0xe5   :  { %v952_v22 = vadd.f32 %v951_v12, %v950_v11 }
  0xe6   :  { %v953_v14 = vpop.f32.mrf.mxu0  ;;  %v973_v15 = vpop.f32.mrf.mxu1 }
  0xe7   :  { %v501_v25 = vadd.f32 %v952_v22, %v857_v24  ;;  %v974_v26 = vadd.f32 %v973_v15, %v972_v13 }
  0xe8   :  { %v954_v16 = vpop.f32.mrf.mxu0  ;;  %v975_v17 = vpop.f32.mrf.mxu1 }
  0xe9   :  { %v541_v29 = vadd.f32 %v974_v26, %v501_v25 }
  0xea   :  { %v976_v18 = vpop.f32.mrf.mxu1 }
  0xec   :  { %v620_v19 = vpop.f32.mrf.mxu1 }
  0xee   :  { %v1027_v20 = vpop.f32.mrf.mxu1 }
  0xf0   :  { %v623_v21 = vpop.f32.mrf.mxu1 }
  0xf2   :  { %v1028_v23 = vpop.f32.mrf.mxu1 }
 0x102   :  { %v994_v27 = vpop.f32.mrf.mxu0 }
 0x104   :  { %v995_v28 = vpop.f32.mrf.mxu0 }
 0x105   :  { %v996_v30 = vadd.f32 %v995_v28, %v994_v27 }
 0x106   :  { %v997_v31 = vpop.f32.mrf.mxu0 }
 0x107   :  { %v581_v32 = vadd.f32 %v996_v30, %v541_v29 }
 0x108   :  { %v998_v33 = vpop.f32.mrf.mxu0 }
 0x109   :  { %v621_v34 = vadd.f32 %v620_v19, %v581_v32 }
 0x10b   :  { %v626_v35 = vmax.f32 %v621_v34, 0.0 }
 0x10d   :  { %v627_v36 = vpack.c.bf16 %v626_v35, %v626_v35 }
 0x10f   :  { %1046 = vmatmul.mubr.bf16.vlgmr.msra.gmra.mxu1 %v627_v36 }
 0x1cf   :  { %v733_v40 = vpop.f32.mrf.mxu1 }
 0x1d0   :  { %v734_v42 = vadd.f32 %v916_v39, %v733_v40 }
 0x1d1   :  { %v1047_v43 = vpop.f32.mrf.mxu1 }
 0x1d2   :  { %v739_v44 = vmax.f32 %v734_v42, 0.0 }
 0x1d3   :  { %v736_v45 = vpop.f32.mrf.mxu1 }
 0x1d4   :  { %v740_v46 = vpack.c.bf16 %v739_v44, %v739_v44 }
 0x1d5   :  { %v1048_v47 = vpop.f32.mrf.mxu1 }
 0x1d6   :  { %1066 = vmatmul.mubr.bf16.vlgmr.msra.gmra.mxu0 %v740_v46 }
 0x296   :  { %v846_v48 = vpop.f32.mrf.mxu0 }
 0x297   :  { %v847_v49 = vadd.f32 %v925_v41, %v846_v48 }
 0x298   :  { %v1067_v50 = vpop.f32.mrf.mxu0 }
 0x299   :  { %852 = vst [vmem:[%s1439_s7] sm:$0xff] %v847_v49 }
 0x29a   :  { %v849_v51 = vpop.f32.mrf.mxu0 }
 0x29c   :  { %v1068_v52 = vpop.f32.mrf.mxu0 }

</bundles_post_ra>
